<compile_context>
chip_gen: v5e
topology: v5e:2x2
jax: 0.10.0
libtpu: 0.0.40
codegen_flags: <defaults>
</compile_context>

<pallas_src>
import math
import jax
import jax.numpy as jnp
from jax import lax
from jax.experimental import pallas as pl
from jax.experimental.pallas import tpu as pltpu


# --------------------------------------------------------------------------- #
# Kernel body
# --------------------------------------------------------------------------- #
def _make_kernel(head_count: int, model_dim: int, seq_len: int, bt: int,
                 eps: float = 1e-5):
    D, S, H = model_dim, seq_len, head_count
    dh = D // H

    def kernel(x_ref, wqkv_ref, bqkv_ref, wo_ref, bo_ref,
               ln_g_ref, ln_b_ref, w1_ref, b1_ref, w2_ref, b2_ref,
               out_ref, attn_ref, ctx_ref):
        x = x_ref[...]                              # (bt, S, D) f32
        xr = x.reshape(bt * S, D)                   # row-flattened for the MXU
        xb = xr.astype(jnp.bfloat16)

        # ---- fused QKV projection: one wide bf16 matmul, f32 accumulate ----
        # (1/sqrt(dh) query scale already folded into wqkv / bqkv on host.)
        # Cast to bf16 ONCE, right after the bias add: qkv is the largest
        # activation and every downstream consumer wants bf16 MXU operands.
        qkv = (jnp.dot(xb, wqkv_ref[...], preferred_element_type=jnp.float32)
               + bqkv_ref[...]).astype(jnp.bfloat16)
        qkv3 = qkv.reshape(bt, S, 3 * D)            # (bt, S, 3D) bf16

        # ---- per-head attention (leading batch dim bt), ctx -> scratch slab --
        for h in range(H):                          # static unrolled loop
            lo = h * dh
            qh = qkv3[:, :, lo:lo + dh]                         # (bt,S,dh) bf16
            kh = qkv3[:, :, D + lo:D + lo + dh]
            vh = qkv3[:, :, 2 * D + lo:2 * D + lo + dh]

            # contract last dims directly (no explicit .T / XLU transpose)
            scores = jnp.einsum('bqd,bkd->bqk', qh, kh,
                                preferred_element_type=jnp.float32)  # (bt,S,S)
            m = jnp.max(scores, axis=-1, keepdims=True)
            p = jnp.exp(scores - m)
            denom = jnp.sum(p, axis=-1, keepdims=True)
            if h == 0:
                # Exact reciprocal for the returned top_attn (rows sum to 1).
                attn = p / denom
                attn_ref[...] = attn
            else:
                attn = p * pl.reciprocal(denom, approx=True)     # EUP vrcp
            ctx_h = jnp.einsum('bqk,bkd->bqd', attn.astype(jnp.bfloat16), vh,
                               preferred_element_type=jnp.float32)
            ctx_ref[:, :, lo:lo + dh] = ctx_h.astype(jnp.bfloat16)

        ctx = ctx_ref[...].reshape(bt * S, D)       # bf16, feeds Wo directly

        # ---- output projection + residual (f32) ----
        mha = jnp.dot(ctx, wo_ref[...],
                      preferred_element_type=jnp.float32) + bo_ref[...]
        r = mha + xr

        # ---- LayerNorm over model_dim (biased variance, matches PyTorch) ----
        mu = jnp.mean(r, axis=-1, keepdims=True)
        c = r - mu
        var = jnp.mean(c * c, axis=-1, keepdims=True)
        y = c * lax.rsqrt(var + eps)
        y = y * ln_g_ref[...] + ln_b_ref[...]

        # ---- Resblock: y + W2(relu(W1 y + b1)) + b2 ----
        h1 = jnp.maximum(
            jnp.dot(y.astype(jnp.bfloat16), w1_ref[...],
                    preferred_element_type=jnp.float32) + b1_ref[...], 0.0)
        res = y + jnp.dot(h1.astype(jnp.bfloat16), w2_ref[...],
                          preferred_element_type=jnp.float32) + b2_ref[...]

        out_ref[...] = res.reshape(bt, S, D)

    return kernel


# --------------------------------------------------------------------------- #
# Per-generation VMEM budgeting
# --------------------------------------------------------------------------- #
_MiB = 1 << 20

# vmem_limit : scoped VMEM limit handed to Mosaic (None -> compiler default).
# budget     : per-grid-step residency ceiling used to pick the batch tile.
# row_target : stop growing the tile once bt*S rows reach this (MXU feed).
# min_grid   : minimum number of grid steps (2 on v7x so both TCs get work).
_GEN_CFG = {
    "v5e":     dict(vmem_limit=64 * _MiB, budget=44 * _MiB, row_target=128, min_grid=1),
    "v5p":     dict(vmem_limit=96 * _MiB, budget=72 * _MiB, row_target=256, min_grid=1),
    "v6e":     dict(vmem_limit=96 * _MiB, budget=72 * _MiB, row_target=512, min_grid=1),
    "v7x":     dict(vmem_limit=48 * _MiB, budget=26 * _MiB, row_target=256, min_grid=2),
    "unknown": dict(vmem_limit=None,      budget=10 * _MiB, row_target=256, min_grid=1),
}
_DEFAULT_VMEM_CAP = {"v5e": 128 * _MiB, "v5p": 128 * _MiB, "v6e": 128 * _MiB,
                     "v7x": 64 * _MiB, "unknown": 64 * _MiB}


def _device_config():
    gen = "unknown"
    try:
        kind = jax.devices()[0].device_kind.lower()
        if "v5" in kind and ("lite" in kind or "v5e" in kind):
            gen = "v5e"
        elif "v5" in kind:
            gen = "v5p"
        elif "v6" in kind:
            gen = "v6e"
        elif "v7" in kind or "tpu7" in kind or "7x" in kind:
            gen = "v7x"
    except Exception:
        pass

    cfg = dict(_GEN_CFG[gen])
    cap = _DEFAULT_VMEM_CAP[gen]
    try:  # prefer the runtime-reported physical VMEM when available
        cap = int(pltpu.get_tpu_info().vmem_capacity_bytes)
    except Exception:
        pass
    if cfg["vmem_limit"] is not None:
        cfg["vmem_limit"] = min(cfg["vmem_limit"], cap * 3 // 4)
        cfg["budget"] = min(cfg["budget"], cfg["vmem_limit"] * 3 // 4)
    return gen, cfg


def _estimate_vmem_bytes(bt, S, D):
    """Per-grid-step VMEM residency for a (bt, S, D) batch tile."""
    f32, bf16 = 4, 2
    rows = bt * S
    x_block    = 2 * rows * D * f32        # input block, double-buffered
    out_block  = 2 * rows * D * f32        # output block, double-buffered
    attn_block = 2 * bt * S * S * f32      # top_attn output, double-buffered
    ctx_slab   = rows * D * bf16           # bf16 scratch slab (single)
    qkv_act    = rows * 3 * D * bf16       # bf16 fused-QKV activation
    scores_act = 2 * bt * S * S * f32      # one head's scores + exp(p) live
    misc_act   = 4 * rows * D * f32        # xr / mha / y / h1 style slabs
    weights    = 6 * D * D * bf16          # wqkv + wo + w1 + w2, single-buffered
    biases     = 2 * 9 * D * f32
    return (x_block + out_block + attn_block + ctx_slab + qkv_act
            + scores_act + misc_act + weights + biases)


def _pick_batch_tile(B, S, D, budget, row_target, min_grid):
    """Largest divisor of B that fits the VMEM budget and honours min_grid."""
    max_bt = max(1, B // min_grid) if B >= min_grid else B
    best = 1
    for cand in range(1, max_bt + 1):
        if B % cand:
            continue
        if _estimate_vmem_bytes(cand, S, D) > budget:
            break                         # estimate is monotone in cand
        best = cand
        if cand * S >= row_target:
            break                         # enough rows to feed the MXU
    return best


# --------------------------------------------------------------------------- #
# pallas_call wrapper
# --------------------------------------------------------------------------- #
def _build_call(B, S, D, H, bt, vmem_limit, single_buffer_weights):
    grid = (B // bt,)

    def const_spec(shape):
        # Grid-invariant weight/bias blocks; single-buffer them when supported
        # (default pipelining keeps 2 VMEM copies of every weight).
        if single_buffer_weights:
            return pl.BlockSpec(shape, lambda b: (0,) * len(shape),
                                pipeline_mode=pl.Buffered(1))
        return pl.BlockSpec(shape, lambda b: (0,) * len(shape))

    in_specs = [
        pl.BlockSpec((bt, S, D), lambda b: (b, 0, 0)),   # x
        const_spec((D, 3 * D)),                          # wqkv (bf16)
        const_spec((1, 3 * D)),                          # bqkv
        const_spec((D, D)),                              # wo   (bf16)
        const_spec((1, D)),                              # bo
        const_spec((1, D)),                              # ln gamma
        const_spec((1, D)),                              # ln beta
        const_spec((D, D)),                              # resblock W1 (bf16)
        const_spec((1, D)),                              # resblock b1
        const_spec((D, D)),                              # resblock W2 (bf16)
        const_spec((1, D)),                              # resblock b2
    ]
    out_specs = [
        pl.BlockSpec((bt, S, D), lambda b: (b, 0, 0)),   # output
        pl.BlockSpec((bt, S, S), lambda b: (b, 0, 0)),   # top_attn (head 0)
    ]

    # Advisory scheduling hint for XLA around the custom call.
    flops = (2 * B * S * D * 3 * D          # fused QKV
             + 4 * B * S * S * D            # QK^T + P@V over all heads
             + 2 * B * S * D * D            # Wo
             + 4 * B * S * D * D)           # resblock W1 + W2
    cost = pl.CostEstimate(
        flops=int(flops),
        transcendentals=int(B * S * S * H + B * S),
        bytes_accessed=int(2 * 4 * B * S * D + 4 * B * S * S + 2 * 6 * D * D),
    )

    kernel = _make_kernel(H, D, S, bt)

    return pl.pallas_call(
        kernel,
        out_shape=(jax.ShapeDtypeStruct((B, S, D), jnp.float32),
                   jax.ShapeDtypeStruct((B, S, S), jnp.float32)),
        grid_spec=pltpu.PrefetchScalarGridSpec(
            num_scalar_prefetch=0,
            grid=grid,
            in_specs=in_specs,
            out_specs=out_specs,
            scratch_shapes=[pltpu.VMEM((bt, S, D), jnp.bfloat16)],  # ctx slab
        ),
        compiler_params=pltpu.CompilerParams(
            dimension_semantics=("parallel",),
            vmem_limit_bytes=vmem_limit),
        cost_estimate=cost,
    )


def ident_layer1(x, params, head_count):
    """x: (B, S, D) float32.  params: dict from prepare_kernel_params()."""
    B, S, D = x.shape
    assert D % head_count == 0
    # NOTE: for production shapes keep D % 128 == 0 and S % 8 == 0 so head
    # slices and blocks stay lane/sublane dense; small toy shapes are fine
    # because each block spans the full array dimension.
    _, cfg = _device_config()
    bt = _pick_batch_tile(B, S, D, cfg["budget"], cfg["row_target"],
                          cfg["min_grid"])

    args = (x,
            params["wqkv"], params["bqkv"], params["wo"], params["bo"],
            params["ln_g"], params["ln_b"],
            params["w1"], params["b1"], params["w2"], params["b2"])

    try:
        # Preferred path: grid-invariant weights single-buffered.
        fn = _build_call(B, S, D, head_count, bt, cfg["vmem_limit"], True)
        return fn(*args)
    except Exception:
        # Fallback for jax builds that reject pl.Buffered(1) on a BlockSpec.
        fn = _build_call(B, S, D, head_count, bt, cfg["vmem_limit"], False)
        return fn(*args)


# --------------------------------------------------------------------------- #
# Parameters & reference
# --------------------------------------------------------------------------- #
def init_params(key, model_dim):
    """Raw f32 parameters (PyTorch-equivalent layout)."""
    D = model_dim
    ks = jax.random.split(key, 8)
    return {
        "wq": jax.random.normal(ks[0], (D, D), jnp.float32) * 0.1,
        "bq": jnp.zeros((1, D), jnp.float32),
        "wk": jax.random.normal(ks[1], (D, D), jnp.float32) * 0.1,
        "bk": jnp.zeros((1, D), jnp.float32),
        "wv": jax.random.normal(ks[2], (D, D), jnp.float32) * 0.1,
        "bv": jnp.zeros((1, D), jnp.float32),
        "wo": jax.random.normal(ks[3], (D, D), jnp.float32) * 0.1,
        "bo": jnp.zeros((1, D), jnp.float32),
        "ln_g": jnp.ones((1, D), jnp.float32),
        "ln_b": jnp.zeros((1, D), jnp.float32),
        "w1": jax.random.normal(ks[4], (D, D), jnp.float32) * 0.1,
        "b1": jnp.zeros((1, D), jnp.float32),
        "w2": jax.random.normal(ks[5], (D, D), jnp.float32) * 0.1,
        "b2": jnp.zeros((1, D), jnp.float32),
    }


def prepare_kernel_params(p, head_count):
    """Host-side fusion: fold query scale, fuse QKV, cast weights to bf16."""
    D = p["wq"].shape[0]
    scale = 1.0 / math.sqrt(D // head_count)
    wqkv = jnp.concatenate([p["wq"] * scale, p["wk"], p["wv"]], axis=1)
    bqkv = jnp.concatenate([p["bq"] * scale, p["bk"], p["bv"]], axis=1)
    return {
        "wqkv": wqkv.astype(jnp.bfloat16),
        "bqkv": bqkv,                      # biases stay f32 (post-accumulate add)
        "wo": p["wo"].astype(jnp.bfloat16), "bo": p["bo"],
        "ln_g": p["ln_g"], "ln_b": p["ln_b"],
        "w1": p["w1"].astype(jnp.bfloat16), "b1": p["b1"],
        "w2": p["w2"].astype(jnp.bfloat16), "b2": p["b2"],
    }


def ident_layer1_ref(x, p, head_count, eps=1e-5):
    """Pure-JAX f32 reference (tolerance check only)."""
    B, S, D = x.shape
    dh = D // head_count

    def proj(w, b):
        return jnp.einsum('bsd,de->bse', x, w) + b

    def heads(t):
        return t.reshape(B, S, head_count, dh).transpose(0, 2, 1, 3)

    q = heads(proj(p["wq"], p["bq"])) / math.sqrt(dh)
    k = heads(proj(p["wk"], p["bk"]))
    v = heads(proj(p["wv"], p["bv"]))
    scores = jnp.einsum('bhqd,bhkd->bhqk', q, k)
    attn = jax.nn.softmax(scores, axis=-1)
    ctx = jnp.einsum('bhqk,bhkd->bhqd', attn, v)
    ctx = ctx.transpose(0, 2, 1, 3).reshape(B, S, D)
    mha = jnp.einsum('bsd,de->bse', ctx, p["wo"]) + p["bo"]
    r = mha + x
    mu = r.mean(-1, keepdims=True)
    var = ((r - mu) ** 2).mean(-1, keepdims=True)
    y = (r - mu) / jnp.sqrt(var + eps) * p["ln_g"] + p["ln_b"]
    h1 = jax.nn.relu(jnp.einsum('bsd,de->bse', y, p["w1"]) + p["b1"])
    out = y + jnp.einsum('bsd,de->bse', h1, p["w2"]) + p["b2"]
    return out, attn[:, 0]


if __name__ == "__main__":
    B, S, D, H = 2, 8, 32, 4          # batch, seq, model_dim, head_count
    key = jax.random.PRNGKey(0)
    kx, kparam = jax.random.split(key)
    x = jax.random.normal(kx, (B, S, D), jnp.float32)

    raw_params = init_params(kparam, D)
    kern_params = prepare_kernel_params(raw_params, H)

    out, top_attn = ident_layer1(x, kern_params, head_count=H)
    jax.block_until_ready((out, top_attn))

    ref_out, ref_attn = ident_layer1_ref(x, raw_params, H)
    assert out.shape == (B, S, D) and top_attn.shape == (B, S, S)
    assert float(jnp.max(jnp.abs(out - ref_out))) < 1e-1
    assert float(jnp.max(jnp.abs(top_attn - ref_attn))) < 5e-2
    print("KERNEL_OK")
</pallas_src>

<mosaic_0001>
module attributes {stable_mosaic.version = 11 : i64} {
  func.func @kernel(%arg0: i32, %arg1: memref<2x8x32xf32, #tpu.memory_space<vmem>>, %arg2: memref<32x96xbf16, #tpu.memory_space<vmem>>, %arg3: memref<1x96xf32, #tpu.memory_space<vmem>>, %arg4: memref<32x32xbf16, #tpu.memory_space<vmem>>, %arg5: memref<1x32xf32, #tpu.memory_space<vmem>>, %arg6: memref<1x32xf32, #tpu.memory_space<vmem>>, %arg7: memref<1x32xf32, #tpu.memory_space<vmem>>, %arg8: memref<32x32xbf16, #tpu.memory_space<vmem>>, %arg9: memref<1x32xf32, #tpu.memory_space<vmem>>, %arg10: memref<32x32xbf16, #tpu.memory_space<vmem>>, %arg11: memref<1x32xf32, #tpu.memory_space<vmem>>, %arg12: memref<2x8x32xf32, #tpu.memory_space<vmem>>, %arg13: memref<2x8x8xf32, #tpu.memory_space<vmem>>, %arg14: memref<2x8x32xbf16, #tpu.memory_space<vmem>>) attributes {dimension_semantics = [#tpu.dimension_semantics<parallel>], iteration_bounds = array<i64: 1>, scalar_prefetch = 0 : i64, scratch_operands = 1 : i64, tpu.core_type = #tpu.core_type<tc>, window_params = [{transform_indices = @transform_0, window_bounds = array<i64: 2, 8, 32>}, {pipeline_mode = #tpu.pipeline_mode<synchronous>, transform_indices = @transform_1, window_bounds = array<i64: 32, 96>}, {pipeline_mode = #tpu.pipeline_mode<synchronous>, transform_indices = @transform_2, window_bounds = array<i64: 1, 96>}, {pipeline_mode = #tpu.pipeline_mode<synchronous>, transform_indices = @transform_3, window_bounds = array<i64: 32, 32>}, {pipeline_mode = #tpu.pipeline_mode<synchronous>, transform_indices = @transform_4, window_bounds = array<i64: 1, 32>}, {pipeline_mode = #tpu.pipeline_mode<synchronous>, transform_indices = @transform_5, window_bounds = array<i64: 1, 32>}, {pipeline_mode = #tpu.pipeline_mode<synchronous>, transform_indices = @transform_6, window_bounds = array<i64: 1, 32>}, {pipeline_mode = #tpu.pipeline_mode<synchronous>, transform_indices = @transform_7, window_bounds = array<i64: 32, 32>}, {pipeline_mode = #tpu.pipeline_mode<synchronous>, transform_indices = @transform_8, window_bounds = array<i64: 1, 32>}, {pipeline_mode = #tpu.pipeline_mode<synchronous>, transform_indices = @transform_9, window_bounds = array<i64: 32, 32>}, {pipeline_mode = #tpu.pipeline_mode<synchronous>, transform_indices = @transform_10, window_bounds = array<i64: 1, 32>}, {transform_indices = @transform_11, window_bounds = array<i64: 2, 8, 32>}, {transform_indices = @transform_12, window_bounds = array<i64: 2, 8, 8>}]} {
    %c0 = arith.constant 0 : index
    %c0_0 = arith.constant 0 : index
    %c0_1 = arith.constant 0 : index
    %0 = vector.load %arg1[%c0, %c0_0, %c0_1] : memref<2x8x32xf32, #tpu.memory_space<vmem>>, vector<2x8x32xf32>
    %1 = vector.shape_cast %0 : vector<2x8x32xf32> to vector<16x32xf32>
    %2 = arith.truncf %1 : vector<16x32xf32> to vector<16x32xbf16>
    %c0_2 = arith.constant 0 : index
    %c0_3 = arith.constant 0 : index
    %3 = vector.load %arg2[%c0_2, %c0_3] : memref<32x96xbf16, #tpu.memory_space<vmem>>, vector<32x96xbf16>
    %cst = arith.constant dense<0.000000e+00> : vector<16x96xf32>
    %4 = tpu.matmul %2, %3, %cst {dimension_numbers = #tpu.dot_dimension_numbers<[1], [0], [0], [1], [0, 0, 1, 1], [], []>} : vector<16x32xbf16>, vector<32x96xbf16>, vector<16x96xf32> -> vector<16x96xf32>
    %c0_4 = arith.constant 0 : index
    %c0_5 = arith.constant 0 : index
    %5 = vector.load %arg3[%c0_4, %c0_5] : memref<1x96xf32, #tpu.memory_space<vmem>>, vector<1x96xf32>
    %6 = vector.broadcast %5 : vector<1x96xf32> to vector<16x96xf32>
    %7 = arith.addf %4, %6 : vector<16x96xf32>
    %8 = arith.truncf %7 : vector<16x96xf32> to vector<16x96xbf16>
    %9 = vector.shape_cast %8 : vector<16x96xbf16> to vector<2x8x96xbf16>
    %10 = vector.extract_strided_slice %9 {offsets = [0, 0, 0], sizes = [2, 8, 8], strides = [1, 1, 1]} : vector<2x8x96xbf16> to vector<2x8x8xbf16>
    %11 = vector.extract_strided_slice %9 {offsets = [0, 0, 32], sizes = [2, 8, 8], strides = [1, 1, 1]} : vector<2x8x96xbf16> to vector<2x8x8xbf16>
    %12 = vector.extract_strided_slice %9 {offsets = [0, 0, 64], sizes = [2, 8, 8], strides = [1, 1, 1]} : vector<2x8x96xbf16> to vector<2x8x8xbf16>
    "tpu.trace_start"() <{level = 10 : i32, message = "bqd,bkd->bqk"}> : () -> ()
    %cst_6 = arith.constant dense<0.000000e+00> : vector<2x8x8xf32>
    %13 = tpu.matmul %10, %11, %cst_6 {dimension_numbers = #tpu.dot_dimension_numbers<[2], [2], [1], [1], [0, 0, 0, 1, 1, 1], [0], [0]>} : vector<2x8x8xbf16>, vector<2x8x8xbf16>, vector<2x8x8xf32> -> vector<2x8x8xf32>
    "tpu.trace_stop"() : () -> ()
    %cst_7 = arith.constant dense<0xFF800000> : vector<2x8xf32>
    %14 = vector.multi_reduction <maximumf>, %13, %cst_7 [2] : vector<2x8x8xf32> to vector<2x8xf32>
    %15 = vector.shape_cast %14 : vector<2x8xf32> to vector<2x8x1xf32>
    %16 = vector.broadcast %15 : vector<2x8x1xf32> to vector<2x8x8xf32>
    %17 = arith.subf %13, %16 : vector<2x8x8xf32>
    %18 = math.exp %17 : vector<2x8x8xf32>
    %cst_8 = arith.constant dense<0.000000e+00> : vector<2x8xf32>
    %19 = vector.multi_reduction <add>, %18, %cst_8 [2] : vector<2x8x8xf32> to vector<2x8xf32>
    %20 = vector.shape_cast %19 : vector<2x8xf32> to vector<2x8x1xf32>
    %21 = vector.broadcast %20 : vector<2x8x1xf32> to vector<2x8x8xf32>
    %22 = arith.divf %18, %21 : vector<2x8x8xf32>
    %c0_9 = arith.constant 0 : index
    %c0_10 = arith.constant 0 : index
    %c0_11 = arith.constant 0 : index
    %23 = vector.load %arg13[%c0_9, %c0_10, %c0_11] : memref<2x8x8xf32, #tpu.memory_space<vmem>>, vector<2x8x8xf32>
    tpu.vector_store %arg13[%c0_9, %c0_10, %c0_11], %22 {strides = array<i32>} : memref<2x8x8xf32, #tpu.memory_space<vmem>>, vector<2x8x8xf32>,
    %24 = arith.truncf %22 : vector<2x8x8xf32> to vector<2x8x8xbf16>
    "tpu.trace_start"() <{level = 10 : i32, message = "bqk,bkd->bqd"}> : () -> ()
    %cst_12 = arith.constant dense<0.000000e+00> : vector<2x8x8xf32>
    %25 = tpu.matmul %24, %12, %cst_12 {dimension_numbers = #tpu.dot_dimension_numbers<[2], [1], [1], [2], [0, 0, 0, 1, 1, 2], [0], [0]>} : vector<2x8x8xbf16>, vector<2x8x8xbf16>, vector<2x8x8xf32> -> vector<2x8x8xf32>
    "tpu.trace_stop"() : () -> ()
    %26 = arith.truncf %25 : vector<2x8x8xf32> to vector<2x8x8xbf16>
    %c0_13 = arith.constant 0 : index
    %c0_14 = arith.constant 0 : index
    %c0_15 = arith.constant 0 : index
    %27 = vector.load %arg14[%c0_13, %c0_14, %c0_15] : memref<2x8x32xbf16, #tpu.memory_space<vmem>>, vector<2x8x8xbf16>
    tpu.vector_store %arg14[%c0_13, %c0_14, %c0_15], %26 {strides = array<i32>} : memref<2x8x32xbf16, #tpu.memory_space<vmem>>, vector<2x8x8xbf16>,
    %28 = vector.extract_strided_slice %9 {offsets = [0, 0, 8], sizes = [2, 8, 8], strides = [1, 1, 1]} : vector<2x8x96xbf16> to vector<2x8x8xbf16>
    %29 = vector.extract_strided_slice %9 {offsets = [0, 0, 40], sizes = [2, 8, 8], strides = [1, 1, 1]} : vector<2x8x96xbf16> to vector<2x8x8xbf16>
    %30 = vector.extract_strided_slice %9 {offsets = [0, 0, 72], sizes = [2, 8, 8], strides = [1, 1, 1]} : vector<2x8x96xbf16> to vector<2x8x8xbf16>
    "tpu.trace_start"() <{level = 10 : i32, message = "bqd,bkd->bqk"}> : () -> ()
    %cst_16 = arith.constant dense<0.000000e+00> : vector<2x8x8xf32>
    %31 = tpu.matmul %28, %29, %cst_16 {dimension_numbers = #tpu.dot_dimension_numbers<[2], [2], [1], [1], [0, 0, 0, 1, 1, 1], [0], [0]>} : vector<2x8x8xbf16>, vector<2x8x8xbf16>, vector<2x8x8xf32> -> vector<2x8x8xf32>
    "tpu.trace_stop"() : () -> ()
    %cst_17 = arith.constant dense<0xFF800000> : vector<2x8xf32>
    %32 = vector.multi_reduction <maximumf>, %31, %cst_17 [2] : vector<2x8x8xf32> to vector<2x8xf32>
    %33 = vector.shape_cast %32 : vector<2x8xf32> to vector<2x8x1xf32>
    %34 = vector.broadcast %33 : vector<2x8x1xf32> to vector<2x8x8xf32>
    %35 = arith.subf %31, %34 : vector<2x8x8xf32>
    %36 = math.exp %35 : vector<2x8x8xf32>
    %cst_18 = arith.constant dense<0.000000e+00> : vector<2x8xf32>
    %37 = vector.multi_reduction <add>, %36, %cst_18 [2] : vector<2x8x8xf32> to vector<2x8xf32>
    %38 = vector.shape_cast %37 : vector<2x8xf32> to vector<2x8x1xf32>
    %39 = tpu.reciprocal %38 {approx = true} : vector<2x8x1xf32> -> vector<2x8x1xf32>
    %40 = vector.broadcast %39 : vector<2x8x1xf32> to vector<2x8x8xf32>
    %41 = arith.mulf %36, %40 : vector<2x8x8xf32>
    %42 = arith.truncf %41 : vector<2x8x8xf32> to vector<2x8x8xbf16>
    "tpu.trace_start"() <{level = 10 : i32, message = "bqk,bkd->bqd"}> : () -> ()
    %cst_19 = arith.constant dense<0.000000e+00> : vector<2x8x8xf32>
    %43 = tpu.matmul %42, %30, %cst_19 {dimension_numbers = #tpu.dot_dimension_numbers<[2], [1], [1], [2], [0, 0, 0, 1, 1, 2], [0], [0]>} : vector<2x8x8xbf16>, vector<2x8x8xbf16>, vector<2x8x8xf32> -> vector<2x8x8xf32>
    "tpu.trace_stop"() : () -> ()
    %44 = arith.truncf %43 : vector<2x8x8xf32> to vector<2x8x8xbf16>
    %c0_20 = arith.constant 0 : index
    %c0_21 = arith.constant 0 : index
    %c8 = arith.constant 8 : index
    %45 = vector.load %arg14[%c0_20, %c0_21, %c8] : memref<2x8x32xbf16, #tpu.memory_space<vmem>>, vector<2x8x8xbf16>
    tpu.vector_store %arg14[%c0_20, %c0_21, %c8], %44 {strides = array<i32>} : memref<2x8x32xbf16, #tpu.memory_space<vmem>>, vector<2x8x8xbf16>,
    %46 = vector.extract_strided_slice %9 {offsets = [0, 0, 16], sizes = [2, 8, 8], strides = [1, 1, 1]} : vector<2x8x96xbf16> to vector<2x8x8xbf16>
    %47 = vector.extract_strided_slice %9 {offsets = [0, 0, 48], sizes = [2, 8, 8], strides = [1, 1, 1]} : vector<2x8x96xbf16> to vector<2x8x8xbf16>
    %48 = vector.extract_strided_slice %9 {offsets = [0, 0, 80], sizes = [2, 8, 8], strides = [1, 1, 1]} : vector<2x8x96xbf16> to vector<2x8x8xbf16>
    "tpu.trace_start"() <{level = 10 : i32, message = "bqd,bkd->bqk"}> : () -> ()
    %cst_22 = arith.constant dense<0.000000e+00> : vector<2x8x8xf32>
    %49 = tpu.matmul %46, %47, %cst_22 {dimension_numbers = #tpu.dot_dimension_numbers<[2], [2], [1], [1], [0, 0, 0, 1, 1, 1], [0], [0]>} : vector<2x8x8xbf16>, vector<2x8x8xbf16>, vector<2x8x8xf32> -> vector<2x8x8xf32>
    "tpu.trace_stop"() : () -> ()
    %cst_23 = arith.constant dense<0xFF800000> : vector<2x8xf32>
    %50 = vector.multi_reduction <maximumf>, %49, %cst_23 [2] : vector<2x8x8xf32> to vector<2x8xf32>
    %51 = vector.shape_cast %50 : vector<2x8xf32> to vector<2x8x1xf32>
    %52 = vector.broadcast %51 : vector<2x8x1xf32> to vector<2x8x8xf32>
    %53 = arith.subf %49, %52 : vector<2x8x8xf32>
    %54 = math.exp %53 : vector<2x8x8xf32>
    %cst_24 = arith.constant dense<0.000000e+00> : vector<2x8xf32>
    %55 = vector.multi_reduction <add>, %54, %cst_24 [2] : vector<2x8x8xf32> to vector<2x8xf32>
    %56 = vector.shape_cast %55 : vector<2x8xf32> to vector<2x8x1xf32>
    %57 = tpu.reciprocal %56 {approx = true} : vector<2x8x1xf32> -> vector<2x8x1xf32>
    %58 = vector.broadcast %57 : vector<2x8x1xf32> to vector<2x8x8xf32>
    %59 = arith.mulf %54, %58 : vector<2x8x8xf32>
    %60 = arith.truncf %59 : vector<2x8x8xf32> to vector<2x8x8xbf16>
    "tpu.trace_start"() <{level = 10 : i32, message = "bqk,bkd->bqd"}> : () -> ()
    %cst_25 = arith.constant dense<0.000000e+00> : vector<2x8x8xf32>
    %61 = tpu.matmul %60, %48, %cst_25 {dimension_numbers = #tpu.dot_dimension_numbers<[2], [1], [1], [2], [0, 0, 0, 1, 1, 2], [0], [0]>} : vector<2x8x8xbf16>, vector<2x8x8xbf16>, vector<2x8x8xf32> -> vector<2x8x8xf32>
    "tpu.trace_stop"() : () -> ()
    %62 = arith.truncf %61 : vector<2x8x8xf32> to vector<2x8x8xbf16>
    %c0_26 = arith.constant 0 : index
    %c0_27 = arith.constant 0 : index
    %c16 = arith.constant 16 : index
    %63 = vector.load %arg14[%c0_26, %c0_27, %c16] : memref<2x8x32xbf16, #tpu.memory_space<vmem>>, vector<2x8x8xbf16>
    tpu.vector_store %arg14[%c0_26, %c0_27, %c16], %62 {strides = array<i32>} : memref<2x8x32xbf16, #tpu.memory_space<vmem>>, vector<2x8x8xbf16>,
    %64 = vector.extract_strided_slice %9 {offsets = [0, 0, 24], sizes = [2, 8, 8], strides = [1, 1, 1]} : vector<2x8x96xbf16> to vector<2x8x8xbf16>
    %65 = vector.extract_strided_slice %9 {offsets = [0, 0, 56], sizes = [2, 8, 8], strides = [1, 1, 1]} : vector<2x8x96xbf16> to vector<2x8x8xbf16>
    %66 = vector.extract_strided_slice %9 {offsets = [0, 0, 88], sizes = [2, 8, 8], strides = [1, 1, 1]} : vector<2x8x96xbf16> to vector<2x8x8xbf16>
    "tpu.trace_start"() <{level = 10 : i32, message = "bqd,bkd->bqk"}> : () -> ()
    %cst_28 = arith.constant dense<0.000000e+00> : vector<2x8x8xf32>
    %67 = tpu.matmul %64, %65, %cst_28 {dimension_numbers = #tpu.dot_dimension_numbers<[2], [2], [1], [1], [0, 0, 0, 1, 1, 1], [0], [0]>} : vector<2x8x8xbf16>, vector<2x8x8xbf16>, vector<2x8x8xf32> -> vector<2x8x8xf32>
    "tpu.trace_stop"() : () -> ()
    %cst_29 = arith.constant dense<0xFF800000> : vector<2x8xf32>
    %68 = vector.multi_reduction <maximumf>, %67, %cst_29 [2] : vector<2x8x8xf32> to vector<2x8xf32>
    %69 = vector.shape_cast %68 : vector<2x8xf32> to vector<2x8x1xf32>
    %70 = vector.broadcast %69 : vector<2x8x1xf32> to vector<2x8x8xf32>
    %71 = arith.subf %67, %70 : vector<2x8x8xf32>
    %72 = math.exp %71 : vector<2x8x8xf32>
    %cst_30 = arith.constant dense<0.000000e+00> : vector<2x8xf32>
    %73 = vector.multi_reduction <add>, %72, %cst_30 [2] : vector<2x8x8xf32> to vector<2x8xf32>
    %74 = vector.shape_cast %73 : vector<2x8xf32> to vector<2x8x1xf32>
    %75 = tpu.reciprocal %74 {approx = true} : vector<2x8x1xf32> -> vector<2x8x1xf32>
    %76 = vector.broadcast %75 : vector<2x8x1xf32> to vector<2x8x8xf32>
    %77 = arith.mulf %72, %76 : vector<2x8x8xf32>
    %78 = arith.truncf %77 : vector<2x8x8xf32> to vector<2x8x8xbf16>
    "tpu.trace_start"() <{level = 10 : i32, message = "bqk,bkd->bqd"}> : () -> ()
    %cst_31 = arith.constant dense<0.000000e+00> : vector<2x8x8xf32>
    %79 = tpu.matmul %78, %66, %cst_31 {dimension_numbers = #tpu.dot_dimension_numbers<[2], [1], [1], [2], [0, 0, 0, 1, 1, 2], [0], [0]>} : vector<2x8x8xbf16>, vector<2x8x8xbf16>, vector<2x8x8xf32> -> vector<2x8x8xf32>
    "tpu.trace_stop"() : () -> ()
    %80 = arith.truncf %79 : vector<2x8x8xf32> to vector<2x8x8xbf16>
    %c0_32 = arith.constant 0 : index
    %c0_33 = arith.constant 0 : index
    %c24 = arith.constant 24 : index
    %81 = vector.load %arg14[%c0_32, %c0_33, %c24] : memref<2x8x32xbf16, #tpu.memory_space<vmem>>, vector<2x8x8xbf16>
    tpu.vector_store %arg14[%c0_32, %c0_33, %c24], %80 {strides = array<i32>} : memref<2x8x32xbf16, #tpu.memory_space<vmem>>, vector<2x8x8xbf16>,
    %c0_34 = arith.constant 0 : index
    %c0_35 = arith.constant 0 : index
    %c0_36 = arith.constant 0 : index
    %82 = vector.load %arg14[%c0_34, %c0_35, %c0_36] : memref<2x8x32xbf16, #tpu.memory_space<vmem>>, vector<2x8x32xbf16>
    %83 = vector.shape_cast %82 : vector<2x8x32xbf16> to vector<16x32xbf16>
    %c0_37 = arith.constant 0 : index
    %c0_38 = arith.constant 0 : index
    %84 = vector.load %arg4[%c0_37, %c0_38] : memref<32x32xbf16, #tpu.memory_space<vmem>>, vector<32x32xbf16>
    %cst_39 = arith.constant dense<0.000000e+00> : vector<16x32xf32>
    %85 = tpu.matmul %83, %84, %cst_39 {dimension_numbers = #tpu.dot_dimension_numbers<[1], [0], [0], [1], [0, 0, 1, 1], [], []>} : vector<16x32xbf16>, vector<32x32xbf16>, vector<16x32xf32> -> vector<16x32xf32>
    %c0_40 = arith.constant 0 : index
    %c0_41 = arith.constant 0 : index
    %86 = vector.load %arg5[%c0_40, %c0_41] : memref<1x32xf32, #tpu.memory_space<vmem>>, vector<1x32xf32>
    %87 = vector.broadcast %86 : vector<1x32xf32> to vector<16x32xf32>
    %88 = arith.addf %85, %87 : vector<16x32xf32>
    %89 = arith.addf %88, %1 : vector<16x32xf32>
    %cst_42 = arith.constant dense<0.000000e+00> : vector<16xf32>
    %90 = vector.multi_reduction <add>, %89, %cst_42 [1] : vector<16x32xf32> to vector<16xf32>
    %91 = vector.shape_cast %90 : vector<16xf32> to vector<16x1xf32>
    %cst_43 = arith.constant 3.200000e+01 : f32
    %92 = vector.broadcast %cst_43 : f32 to vector<16x1xf32>
    %93 = arith.divf %91, %92 : vector<16x1xf32>
    %94 = vector.broadcast %93 : vector<16x1xf32> to vector<16x32xf32>
    %95 = arith.subf %89, %94 : vector<16x32xf32>
    %96 = arith.mulf %95, %95 : vector<16x32xf32>
    %cst_44 = arith.constant dense<0.000000e+00> : vector<16xf32>
    %97 = vector.multi_reduction <add>, %96, %cst_44 [1] : vector<16x32xf32> to vector<16xf32>
    %98 = vector.shape_cast %97 : vector<16xf32> to vector<16x1xf32>
    %cst_45 = arith.constant 3.200000e+01 : f32
    %99 = vector.broadcast %cst_45 : f32 to vector<16x1xf32>
    %100 = arith.divf %98, %99 : vector<16x1xf32>
    %cst_46 = arith.constant 9.99999974E-6 : f32
    %101 = vector.broadcast %cst_46 : f32 to vector<16x1xf32>
    %102 = arith.addf %100, %101 : vector<16x1xf32>
    %103 = math.rsqrt %102 : vector<16x1xf32>
    %104 = vector.broadcast %103 : vector<16x1xf32> to vector<16x32xf32>
    %105 = arith.mulf %95, %104 : vector<16x32xf32>
    %c0_47 = arith.constant 0 : index
    %c0_48 = arith.constant 0 : index
    %106 = vector.load %arg6[%c0_47, %c0_48] : memref<1x32xf32, #tpu.memory_space<vmem>>, vector<1x32xf32>
    %107 = vector.broadcast %106 : vector<1x32xf32> to vector<16x32xf32>
    %108 = arith.mulf %105, %107 : vector<16x32xf32>
    %c0_49 = arith.constant 0 : index
    %c0_50 = arith.constant 0 : index
    %109 = vector.load %arg7[%c0_49, %c0_50] : memref<1x32xf32, #tpu.memory_space<vmem>>, vector<1x32xf32>
    %110 = vector.broadcast %109 : vector<1x32xf32> to vector<16x32xf32>
    %111 = arith.addf %108, %110 : vector<16x32xf32>
    %112 = arith.truncf %111 : vector<16x32xf32> to vector<16x32xbf16>
    %c0_51 = arith.constant 0 : index
    %c0_52 = arith.constant 0 : index
    %113 = vector.load %arg8[%c0_51, %c0_52] : memref<32x32xbf16, #tpu.memory_space<vmem>>, vector<32x32xbf16>
    %cst_53 = arith.constant dense<0.000000e+00> : vector<16x32xf32>
    %114 = tpu.matmul %112, %113, %cst_53 {dimension_numbers = #tpu.dot_dimension_numbers<[1], [0], [0], [1], [0, 0, 1, 1], [], []>} : vector<16x32xbf16>, vector<32x32xbf16>, vector<16x32xf32> -> vector<16x32xf32>
    %c0_54 = arith.constant 0 : index
    %c0_55 = arith.constant 0 : index
    %115 = vector.load %arg9[%c0_54, %c0_55] : memref<1x32xf32, #tpu.memory_space<vmem>>, vector<1x32xf32>
    %116 = vector.broadcast %115 : vector<1x32xf32> to vector<16x32xf32>
    %117 = arith.addf %114, %116 : vector<16x32xf32>
    %cst_56 = arith.constant 0.000000e+00 : f32
    %118 = vector.broadcast %cst_56 : f32 to vector<16x32xf32>
    %119 = arith.maximumf %117, %118 : vector<16x32xf32>
    %120 = arith.truncf %119 : vector<16x32xf32> to vector<16x32xbf16>
    %c0_57 = arith.constant 0 : index
    %c0_58 = arith.constant 0 : index
    %121 = vector.load %arg10[%c0_57, %c0_58] : memref<32x32xbf16, #tpu.memory_space<vmem>>, vector<32x32xbf16>
    %cst_59 = arith.constant dense<0.000000e+00> : vector<16x32xf32>
    %122 = tpu.matmul %120, %121, %cst_59 {dimension_numbers = #tpu.dot_dimension_numbers<[1], [0], [0], [1], [0, 0, 1, 1], [], []>} : vector<16x32xbf16>, vector<32x32xbf16>, vector<16x32xf32> -> vector<16x32xf32>
    %123 = arith.addf %111, %122 : vector<16x32xf32>
    %c0_60 = arith.constant 0 : index
    %c0_61 = arith.constant 0 : index
    %124 = vector.load %arg11[%c0_60, %c0_61] : memref<1x32xf32, #tpu.memory_space<vmem>>, vector<1x32xf32>
    %125 = vector.broadcast %124 : vector<1x32xf32> to vector<16x32xf32>
    %126 = arith.addf %123, %125 : vector<16x32xf32>
    %127 = vector.shape_cast %126 : vector<16x32xf32> to vector<2x8x32xf32>
    %c0_62 = arith.constant 0 : index
    %c0_63 = arith.constant 0 : index
    %c0_64 = arith.constant 0 : index
    %128 = vector.load %arg12[%c0_62, %c0_63, %c0_64] : memref<2x8x32xf32, #tpu.memory_space<vmem>>, vector<2x8x32xf32>
    tpu.vector_store %arg12[%c0_62, %c0_63, %c0_64], %127 {strides = array<i32>} : memref<2x8x32xf32, #tpu.memory_space<vmem>>, vector<2x8x32xf32>,
    return
  }
  func.func @transform_0(%arg0: i32) -> (i32, i32, i32) {
    %c0_i32 = arith.constant 0 : i32
    %c0_i32_0 = arith.constant 0 : i32
    %c0_i32_1 = arith.constant 0 : i32
    return %arg0, %c0_i32, %c0_i32_0 : i32, i32, i32
  }
  func.func @transform_1(%arg0: i32) -> (i32, i32) {
    %c0_i32 = arith.constant 0 : i32
    %c0_i32_0 = arith.constant 0 : i32
    %c0_i32_1 = arith.constant 0 : i32
    return %c0_i32, %c0_i32_0 : i32, i32
  }
  func.func @transform_2(%arg0: i32) -> (i32, i32) {
    %c0_i32 = arith.constant 0 : i32
    %c0_i32_0 = arith.constant 0 : i32
    %c0_i32_1 = arith.constant 0 : i32
    return %c0_i32, %c0_i32_0 : i32, i32
  }
  func.func @transform_3(%arg0: i32) -> (i32, i32) {
    %c0_i32 = arith.constant 0 : i32
    %c0_i32_0 = arith.constant 0 : i32
    %c0_i32_1 = arith.constant 0 : i32
    return %c0_i32, %c0_i32_0 : i32, i32
  }
  func.func @transform_4(%arg0: i32) -> (i32, i32) {
    %c0_i32 = arith.constant 0 : i32
    %c0_i32_0 = arith.constant 0 : i32
    %c0_i32_1 = arith.constant 0 : i32
    return %c0_i32, %c0_i32_0 : i32, i32
  }
  func.func @transform_5(%arg0: i32) -> (i32, i32) {
    %c0_i32 = arith.constant 0 : i32
    %c0_i32_0 = arith.constant 0 : i32
    %c0_i32_1 = arith.constant 0 : i32
    return %c0_i32, %c0_i32_0 : i32, i32
  }
  func.func @transform_6(%arg0: i32) -> (i32, i32) {
    %c0_i32 = arith.constant 0 : i32
    %c0_i32_0 = arith.constant 0 : i32
    %c0_i32_1 = arith.constant 0 : i32
    return %c0_i32, %c0_i32_0 : i32, i32
  }
  func.func @transform_7(%arg0: i32) -> (i32, i32) {
    %c0_i32 = arith.constant 0 : i32
    %c0_i32_0 = arith.constant 0 : i32
    %c0_i32_1 = arith.constant 0 : i32
    return %c0_i32, %c0_i32_0 : i32, i32
  }
  func.func @transform_8(%arg0: i32) -> (i32, i32) {
    %c0_i32 = arith.constant 0 : i32
    %c0_i32_0 = arith.constant 0 : i32
    %c0_i32_1 = arith.constant 0 : i32
    return %c0_i32, %c0_i32_0 : i32, i32
  }
  func.func @transform_9(%arg0: i32) -> (i32, i32) {
    %c0_i32 = arith.constant 0 : i32
    %c0_i32_0 = arith.constant 0 : i32
    %c0_i32_1 = arith.constant 0 : i32
    return %c0_i32, %c0_i32_0 : i32, i32
  }
  func.func @transform_10(%arg0: i32) -> (i32, i32) {
    %c0_i32 = arith.constant 0 : i32
    %c0_i32_0 = arith.constant 0 : i32
    %c0_i32_1 = arith.constant 0 : i32
    return %c0_i32, %c0_i32_0 : i32, i32
  }
  func.func @transform_11(%arg0: i32) -> (i32, i32, i32) {
    %c0_i32 = arith.constant 0 : i32
    %c0_i32_0 = arith.constant 0 : i32
    %c0_i32_1 = arith.constant 0 : i32
    return %arg0, %c0_i32, %c0_i32_0 : i32, i32, i32
  }
  func.func @transform_12(%arg0: i32) -> (i32, i32, i32) {
    %c0_i32 = arith.constant 0 : i32
    %c0_i32_0 = arith.constant 0 : i32
    %c0_i32_1 = arith.constant 0 : i32
    return %arg0, %c0_i32, %c0_i32_0 : i32, i32, i32
  }
}

module attributes {stable_mosaic.version = 11 : i64} {
  func.func @kernel(%arg0: i32, %arg1: memref<2x8x32xf32, #tpu.memory_space<vmem>>, %arg2: memref<32x96xbf16, #tpu.memory_space<vmem>>, %arg3: memref<1x96xf32, #tpu.memory_space<vmem>>, %arg4: memref<32x32xbf16, #tpu.memory_space<vmem>>, %arg5: memref<1x32xf32, #tpu.memory_space<vmem>>, %arg6: memref<1x32xf32, #tpu.memory_space<vmem>>, %arg7: memref<1x32xf32, #tpu.memory_space<vmem>>, %arg8: memref<32x32xbf16, #tpu.memory_space<vmem>>, %arg9: memref<1x32xf32, #tpu.memory_space<vmem>>, %arg10: memref<32x32xbf16, #tpu.memory_space<vmem>>, %arg11: memref<1x32xf32, #tpu.memory_space<vmem>>, %arg12: memref<2x8x32xf32, #tpu.memory_space<vmem>>, %arg13: memref<2x8x8xf32, #tpu.memory_space<vmem>>, %arg14: memref<2x8x32xbf16, #tpu.memory_space<vmem>>) attributes {dimension_semantics = [#tpu.dimension_semantics<parallel>], iteration_bounds = array<i64: 1>, scalar_prefetch = 0 : i64, scratch_operands = 1 : i64, tpu.core_type = #tpu.core_type<tc>, window_params = [{transform_indices = @transform_0, window_bounds = array<i64: 2, 8, 32>}, {pipeline_mode = #tpu.pipeline_mode<synchronous>, transform_indices = @transform_1, window_bounds = array<i64: 32, 96>}, {pipeline_mode = #tpu.pipeline_mode<synchronous>, transform_indices = @transform_2, window_bounds = array<i64: 1, 96>}, {pipeline_mode = #tpu.pipeline_mode<synchronous>, transform_indices = @transform_3, window_bounds = array<i64: 32, 32>}, {pipeline_mode = #tpu.pipeline_mode<synchronous>, transform_indices = @transform_4, window_bounds = array<i64: 1, 32>}, {pipeline_mode = #tpu.pipeline_mode<synchronous>, transform_indices = @transform_5, window_bounds = array<i64: 1, 32>}, {pipeline_mode = #tpu.pipeline_mode<synchronous>, transform_indices = @transform_6, window_bounds = array<i64: 1, 32>}, {pipeline_mode = #tpu.pipeline_mode<synchronous>, transform_indices = @transform_7, window_bounds = array<i64: 32, 32>}, {pipeline_mode = #tpu.pipeline_mode<synchronous>, transform_indices = @transform_8, window_bounds = array<i64: 1, 32>}, {pipeline_mode = #tpu.pipeline_mode<synchronous>, transform_indices = @transform_9, window_bounds = array<i64: 32, 32>}, {pipeline_mode = #tpu.pipeline_mode<synchronous>, transform_indices = @transform_10, window_bounds = array<i64: 1, 32>}, {transform_indices = @transform_11, window_bounds = array<i64: 2, 8, 32>}, {transform_indices = @transform_12, window_bounds = array<i64: 2, 8, 8>}]} {
    %c0 = arith.constant 0 : index
    %c0_0 = arith.constant 0 : index
    %c0_1 = arith.constant 0 : index
    %0 = vector.load %arg1[%c0, %c0_0, %c0_1] : memref<2x8x32xf32, #tpu.memory_space<vmem>>, vector<2x8x32xf32>
    %1 = vector.shape_cast %0 : vector<2x8x32xf32> to vector<16x32xf32>
    %2 = arith.truncf %1 : vector<16x32xf32> to vector<16x32xbf16>
    %c0_2 = arith.constant 0 : index
    %c0_3 = arith.constant 0 : index
    %3 = vector.load %arg2[%c0_2, %c0_3] : memref<32x96xbf16, #tpu.memory_space<vmem>>, vector<32x96xbf16>
    %cst = arith.constant dense<0.000000e+00> : vector<16x96xf32>
    %4 = tpu.matmul %2, %3, %cst {dimension_numbers = #tpu.dot_dimension_numbers<[1], [0], [0], [1], [0, 0, 1, 1], [], []>} : vector<16x32xbf16>, vector<32x96xbf16>, vector<16x96xf32> -> vector<16x96xf32>
    %c0_4 = arith.constant 0 : index
    %c0_5 = arith.constant 0 : index
    %5 = vector.load %arg3[%c0_4, %c0_5] : memref<1x96xf32, #tpu.memory_space<vmem>>, vector<1x96xf32>
    %6 = vector.broadcast %5 : vector<1x96xf32> to vector<16x96xf32>
    %7 = arith.addf %4, %6 : vector<16x96xf32>
    %8 = arith.truncf %7 : vector<16x96xf32> to vector<16x96xbf16>
    %9 = vector.shape_cast %8 : vector<16x96xbf16> to vector<2x8x96xbf16>
    %10 = vector.extract_strided_slice %9 {offsets = [0, 0, 0], sizes = [2, 8, 8], strides = [1, 1, 1]} : vector<2x8x96xbf16> to vector<2x8x8xbf16>
    %11 = vector.extract_strided_slice %9 {offsets = [0, 0, 32], sizes = [2, 8, 8], strides = [1, 1, 1]} : vector<2x8x96xbf16> to vector<2x8x8xbf16>
    %12 = vector.extract_strided_slice %9 {offsets = [0, 0, 64], sizes = [2, 8, 8], strides = [1, 1, 1]} : vector<2x8x96xbf16> to vector<2x8x8xbf16>
    "tpu.trace_start"() <{level = 10 : i32, message = "bqd,bkd->bqk"}> : () -> ()
    %cst_6 = arith.constant dense<0.000000e+00> : vector<2x8x8xf32>
    %13 = tpu.matmul %10, %11, %cst_6 {dimension_numbers = #tpu.dot_dimension_numbers<[2], [2], [1], [1], [0, 0, 0, 1, 1, 1], [0], [0]>} : vector<2x8x8xbf16>, vector<2x8x8xbf16>, vector<2x8x8xf32> -> vector<2x8x8xf32>
    "tpu.trace_stop"() : () -> ()
    %cst_7 = arith.constant dense<0xFF800000> : vector<2x8xf32>
    %14 = vector.multi_reduction <maximumf>, %13, %cst_7 [2] : vector<2x8x8xf32> to vector<2x8xf32>
    %15 = vector.shape_cast %14 : vector<2x8xf32> to vector<2x8x1xf32>
    %16 = vector.broadcast %15 : vector<2x8x1xf32> to vector<2x8x8xf32>
    %17 = arith.subf %13, %16 : vector<2x8x8xf32>
    %18 = math.exp %17 : vector<2x8x8xf32>
    %cst_8 = arith.constant dense<0.000000e+00> : vector<2x8xf32>
    %19 = vector.multi_reduction <add>, %18, %cst_8 [2] : vector<2x8x8xf32> to vector<2x8xf32>
    %20 = vector.shape_cast %19 : vector<2x8xf32> to vector<2x8x1xf32>
    %21 = vector.broadcast %20 : vector<2x8x1xf32> to vector<2x8x8xf32>
    %22 = arith.divf %18, %21 : vector<2x8x8xf32>
    %c0_9 = arith.constant 0 : index
    %c0_10 = arith.constant 0 : index
    %c0_11 = arith.constant 0 : index
    %23 = vector.load %arg13[%c0_9, %c0_10, %c0_11] : memref<2x8x8xf32, #tpu.memory_space<vmem>>, vector<2x8x8xf32>
    tpu.vector_store %arg13[%c0_9, %c0_10, %c0_11], %22 {strides = array<i32>} : memref<2x8x8xf32, #tpu.memory_space<vmem>>, vector<2x8x8xf32>,
    %24 = arith.truncf %22 : vector<2x8x8xf32> to vector<2x8x8xbf16>
    "tpu.trace_start"() <{level = 10 : i32, message = "bqk,bkd->bqd"}> : () -> ()
    %cst_12 = arith.constant dense<0.000000e+00> : vector<2x8x8xf32>
    %25 = tpu.matmul %24, %12, %cst_12 {dimension_numbers = #tpu.dot_dimension_numbers<[2], [1], [1], [2], [0, 0, 0, 1, 1, 2], [0], [0]>} : vector<2x8x8xbf16>, vector<2x8x8xbf16>, vector<2x8x8xf32> -> vector<2x8x8xf32>
    "tpu.trace_stop"() : () -> ()
    %26 = arith.truncf %25 : vector<2x8x8xf32> to vector<2x8x8xbf16>
    %c0_13 = arith.constant 0 : index
    %c0_14 = arith.constant 0 : index
    %c0_15 = arith.constant 0 : index
    %27 = vector.load %arg14[%c0_13, %c0_14, %c0_15] : memref<2x8x32xbf16, #tpu.memory_space<vmem>>, vector<2x8x8xbf16>
    tpu.vector_store %arg14[%c0_13, %c0_14, %c0_15], %26 {strides = array<i32>} : memref<2x8x32xbf16, #tpu.memory_space<vmem>>, vector<2x8x8xbf16>,
    %28 = vector.extract_strided_slice %9 {offsets = [0, 0, 8], sizes = [2, 8, 8], strides = [1, 1, 1]} : vector<2x8x96xbf16> to vector<2x8x8xbf16>
    %29 = vector.extract_strided_slice %9 {offsets = [0, 0, 40], sizes = [2, 8, 8], strides = [1, 1, 1]} : vector<2x8x96xbf16> to vector<2x8x8xbf16>
    %30 = vector.extract_strided_slice %9 {offsets = [0, 0, 72], sizes = [2, 8, 8], strides = [1, 1, 1]} : vector<2x8x96xbf16> to vector<2x8x8xbf16>
    "tpu.trace_start"() <{level = 10 : i32, message = "bqd,bkd->bqk"}> : () -> ()
    %cst_16 = arith.constant dense<0.000000e+00> : vector<2x8x8xf32>
    %31 = tpu.matmul %28, %29, %cst_16 {dimension_numbers = #tpu.dot_dimension_numbers<[2], [2], [1], [1], [0, 0, 0, 1, 1, 1], [0], [0]>} : vector<2x8x8xbf16>, vector<2x8x8xbf16>, vector<2x8x8xf32> -> vector<2x8x8xf32>
    "tpu.trace_stop"() : () -> ()
    %cst_17 = arith.constant dense<0xFF800000> : vector<2x8xf32>
    %32 = vector.multi_reduction <maximumf>, %31, %cst_17 [2] : vector<2x8x8xf32> to vector<2x8xf32>
    %33 = vector.shape_cast %32 : vector<2x8xf32> to vector<2x8x1xf32>
    %34 = vector.broadcast %33 : vector<2x8x1xf32> to vector<2x8x8xf32>
    %35 = arith.subf %31, %34 : vector<2x8x8xf32>
    %36 = math.exp %35 : vector<2x8x8xf32>
    %cst_18 = arith.constant dense<0.000000e+00> : vector<2x8xf32>
    %37 = vector.multi_reduction <add>, %36, %cst_18 [2] : vector<2x8x8xf32> to vector<2x8xf32>
    %38 = vector.shape_cast %37 : vector<2x8xf32> to vector<2x8x1xf32>
    %39 = tpu.reciprocal %38 {approx = true} : vector<2x8x1xf32> -> vector<2x8x1xf32>
    %40 = vector.broadcast %39 : vector<2x8x1xf32> to vector<2x8x8xf32>
    %41 = arith.mulf %36, %40 : vector<2x8x8xf32>
    %42 = arith.truncf %41 : vector<2x8x8xf32> to vector<2x8x8xbf16>
    "tpu.trace_start"() <{level = 10 : i32, message = "bqk,bkd->bqd"}> : () -> ()
    %cst_19 = arith.constant dense<0.000000e+00> : vector<2x8x8xf32>
    %43 = tpu.matmul %42, %30, %cst_19 {dimension_numbers = #tpu.dot_dimension_numbers<[2], [1], [1], [2], [0, 0, 0, 1, 1, 2], [0], [0]>} : vector<2x8x8xbf16>, vector<2x8x8xbf16>, vector<2x8x8xf32> -> vector<2x8x8xf32>
    "tpu.trace_stop"() : () -> ()
    %44 = arith.truncf %43 : vector<2x8x8xf32> to vector<2x8x8xbf16>
    %c0_20 = arith.constant 0 : index
    %c0_21 = arith.constant 0 : index
    %c8 = arith.constant 8 : index
    %45 = vector.load %arg14[%c0_20, %c0_21, %c8] : memref<2x8x32xbf16, #tpu.memory_space<vmem>>, vector<2x8x8xbf16>
    tpu.vector_store %arg14[%c0_20, %c0_21, %c8], %44 {strides = array<i32>} : memref<2x8x32xbf16, #tpu.memory_space<vmem>>, vector<2x8x8xbf16>,
    %46 = vector.extract_strided_slice %9 {offsets = [0, 0, 16], sizes = [2, 8, 8], strides = [1, 1, 1]} : vector<2x8x96xbf16> to vector<2x8x8xbf16>
    %47 = vector.extract_strided_slice %9 {offsets = [0, 0, 48], sizes = [2, 8, 8], strides = [1, 1, 1]} : vector<2x8x96xbf16> to vector<2x8x8xbf16>
    %48 = vector.extract_strided_slice %9 {offsets = [0, 0, 80], sizes = [2, 8, 8], strides = [1, 1, 1]} : vector<2x8x96xbf16> to vector<2x8x8xbf16>
    "tpu.trace_start"() <{level = 10 : i32, message = "bqd,bkd->bqk"}> : () -> ()
    %cst_22 = arith.constant dense<0.000000e+00> : vector<2x8x8xf32>
    %49 = tpu.matmul %46, %47, %cst_22 {dimension_numbers = #tpu.dot_dimension_numbers<[2], [2], [1], [1], [0, 0, 0, 1, 1, 1], [0], [0]>} : vector<2x8x8xbf16>, vector<2x8x8xbf16>, vector<2x8x8xf32> -> vector<2x8x8xf32>
    "tpu.trace_stop"() : () -> ()
    %cst_23 = arith.constant dense<0xFF800000> : vector<2x8xf32>
    %50 = vector.multi_reduction <maximumf>, %49, %cst_23 [2] : vector<2x8x8xf32> to vector<2x8xf32>
    %51 = vector.shape_cast %50 : vector<2x8xf32> to vector<2x8x1xf32>
    %52 = vector.broadcast %51 : vector<2x8x1xf32> to vector<2x8x8xf32>
    %53 = arith.subf %49, %52 : vector<2x8x8xf32>
    %54 = math.exp %53 : vector<2x8x8xf32>
    %cst_24 = arith.constant dense<0.000000e+00> : vector<2x8xf32>
    %55 = vector.multi_reduction <add>, %54, %cst_24 [2] : vector<2x8x8xf32> to vector<2x8xf32>
    %56 = vector.shape_cast %55 : vector<2x8xf32> to vector<2x8x1xf32>
    %57 = tpu.reciprocal %56 {approx = true} : vector<2x8x1xf32> -> vector<2x8x1xf32>
    %58 = vector.broadcast %57 : vector<2x8x1xf32> to vector<2x8x8xf32>
    %59 = arith.mulf %54, %58 : vector<2x8x8xf32>
    %60 = arith.truncf %59 : vector<2x8x8xf32> to vector<2x8x8xbf16>
    "tpu.trace_start"() <{level = 10 : i32, message = "bqk,bkd->bqd"}> : () -> ()
    %cst_25 = arith.constant dense<0.000000e+00> : vector<2x8x8xf32>
    %61 = tpu.matmul %60, %48, %cst_25 {dimension_numbers = #tpu.dot_dimension_numbers<[2], [1], [1], [2], [0, 0, 0, 1, 1, 2], [0], [0]>} : vector<2x8x8xbf16>, vector<2x8x8xbf16>, vector<2x8x8xf32> -> vector<2x8x8xf32>
    "tpu.trace_stop"() : () -> ()
    %62 = arith.truncf %61 : vector<2x8x8xf32> to vector<2x8x8xbf16>
    %c0_26 = arith.constant 0 : index
    %c0_27 = arith.constant 0 : index
    %c16 = arith.constant 16 : index
    %63 = vector.load %arg14[%c0_26, %c0_27, %c16] : memref<2x8x32xbf16, #tpu.memory_space<vmem>>, vector<2x8x8xbf16>
    tpu.vector_store %arg14[%c0_26, %c0_27, %c16], %62 {strides = array<i32>} : memref<2x8x32xbf16, #tpu.memory_space<vmem>>, vector<2x8x8xbf16>,
    %64 = vector.extract_strided_slice %9 {offsets = [0, 0, 24], sizes = [2, 8, 8], strides = [1, 1, 1]} : vector<2x8x96xbf16> to vector<2x8x8xbf16>
    %65 = vector.extract_strided_slice %9 {offsets = [0, 0, 56], sizes = [2, 8, 8], strides = [1, 1, 1]} : vector<2x8x96xbf16> to vector<2x8x8xbf16>
    %66 = vector.extract_strided_slice %9 {offsets = [0, 0, 88], sizes = [2, 8, 8], strides = [1, 1, 1]} : vector<2x8x96xbf16> to vector<2x8x8xbf16>
    "tpu.trace_start"() <{level = 10 : i32, message = "bqd,bkd->bqk"}> : () -> ()
    %cst_28 = arith.constant dense<0.000000e+00> : vector<2x8x8xf32>
    %67 = tpu.matmul %64, %65, %cst_28 {dimension_numbers = #tpu.dot_dimension_numbers<[2], [2], [1], [1], [0, 0, 0, 1, 1, 1], [0], [0]>} : vector<2x8x8xbf16>, vector<2x8x8xbf16>, vector<2x8x8xf32> -> vector<2x8x8xf32>
    "tpu.trace_stop"() : () -> ()
    %cst_29 = arith.constant dense<0xFF800000> : vector<2x8xf32>
    %68 = vector.multi_reduction <maximumf>, %67, %cst_29 [2] : vector<2x8x8xf32> to vector<2x8xf32>
    %69 = vector.shape_cast %68 : vector<2x8xf32> to vector<2x8x1xf32>
    %70 = vector.broadcast %69 : vector<2x8x1xf32> to vector<2x8x8xf32>
    %71 = arith.subf %67, %70 : vector<2x8x8xf32>
    %72 = math.exp %71 : vector<2x8x8xf32>
    %cst_30 = arith.constant dense<0.000000e+00> : vector<2x8xf32>
    %73 = vector.multi_reduction <add>, %72, %cst_30 [2] : vector<2x8x8xf32> to vector<2x8xf32>
    %74 = vector.shape_cast %73 : vector<2x8xf32> to vector<2x8x1xf32>
    %75 = tpu.reciprocal %74 {approx = true} : vector<2x8x1xf32> -> vector<2x8x1xf32>
    %76 = vector.broadcast %75 : vector<2x8x1xf32> to vector<2x8x8xf32>
    %77 = arith.mulf %72, %76 : vector<2x8x8xf32>
    %78 = arith.truncf %77 : vector<2x8x8xf32> to vector<2x8x8xbf16>
    "tpu.trace_start"() <{level = 10 : i32, message = "bqk,bkd->bqd"}> : () -> ()
    %cst_31 = arith.constant dense<0.000000e+00> : vector<2x8x8xf32>
    %79 = tpu.matmul %78, %66, %cst_31 {dimension_numbers = #tpu.dot_dimension_numbers<[2], [1], [1], [2], [0, 0, 0, 1, 1, 2], [0], [0]>} : vector<2x8x8xbf16>, vector<2x8x8xbf16>, vector<2x8x8xf32> -> vector<2x8x8xf32>
    "tpu.trace_stop"() : () -> ()
    %80 = arith.truncf %79 : vector<2x8x8xf32> to vector<2x8x8xbf16>
    %c0_32 = arith.constant 0 : index
    %c0_33 = arith.constant 0 : index
    %c24 = arith.constant 24 : index
    %81 = vector.load %arg14[%c0_32, %c0_33, %c24] : memref<2x8x32xbf16, #tpu.memory_space<vmem>>, vector<2x8x8xbf16>
    tpu.vector_store %arg14[%c0_32, %c0_33, %c24], %80 {strides = array<i32>} : memref<2x8x32xbf16, #tpu.memory_space<vmem>>, vector<2x8x8xbf16>,
    %c0_34 = arith.constant 0 : index
    %c0_35 = arith.constant 0 : index
    %c0_36 = arith.constant 0 : index
    %82 = vector.load %arg14[%c0_34, %c0_35, %c0_36] : memref<2x8x32xbf16, #tpu.memory_space<vmem>>, vector<2x8x32xbf16>
    %83 = vector.shape_cast %82 : vector<2x8x32xbf16> to vector<16x32xbf16>
    %c0_37 = arith.constant 0 : index
    %c0_38 = arith.constant 0 : index
    %84 = vector.load %arg4[%c0_37, %c0_38] : memref<32x32xbf16, #tpu.memory_space<vmem>>, vector<32x32xbf16>
    %cst_39 = arith.constant dense<0.000000e+00> : vector<16x32xf32>
    %85 = tpu.matmul %83, %84, %cst_39 {dimension_numbers = #tpu.dot_dimension_numbers<[1], [0], [0], [1], [0, 0, 1, 1], [], []>} : vector<16x32xbf16>, vector<32x32xbf16>, vector<16x32xf32> -> vector<16x32xf32>
    %c0_40 = arith.constant 0 : index
    %c0_41 = arith.constant 0 : index
    %86 = vector.load %arg5[%c0_40, %c0_41] : memref<1x32xf32, #tpu.memory_space<vmem>>, vector<1x32xf32>
    %87 = vector.broadcast %86 : vector<1x32xf32> to vector<16x32xf32>
    %88 = arith.addf %85, %87 : vector<16x32xf32>
    %89 = arith.addf %88, %1 : vector<16x32xf32>
    %cst_42 = arith.constant dense<0.000000e+00> : vector<16xf32>
    %90 = vector.multi_reduction <add>, %89, %cst_42 [1] : vector<16x32xf32> to vector<16xf32>
    %91 = vector.shape_cast %90 : vector<16xf32> to vector<16x1xf32>
    %cst_43 = arith.constant 3.200000e+01 : f32
    %92 = vector.broadcast %cst_43 : f32 to vector<16x1xf32>
    %93 = arith.divf %91, %92 : vector<16x1xf32>
    %94 = vector.broadcast %93 : vector<16x1xf32> to vector<16x32xf32>
    %95 = arith.subf %89, %94 : vector<16x32xf32>
    %96 = arith.mulf %95, %95 : vector<16x32xf32>
    %cst_44 = arith.constant dense<0.000000e+00> : vector<16xf32>
    %97 = vector.multi_reduction <add>, %96, %cst_44 [1] : vector<16x32xf32> to vector<16xf32>
    %98 = vector.shape_cast %97 : vector<16xf32> to vector<16x1xf32>
    %cst_45 = arith.constant 3.200000e+01 : f32
    %99 = vector.broadcast %cst_45 : f32 to vector<16x1xf32>
    %100 = arith.divf %98, %99 : vector<16x1xf32>
    %cst_46 = arith.constant 9.99999974E-6 : f32
    %101 = vector.broadcast %cst_46 : f32 to vector<16x1xf32>
    %102 = arith.addf %100, %101 : vector<16x1xf32>
    %103 = math.rsqrt %102 : vector<16x1xf32>
    %104 = vector.broadcast %103 : vector<16x1xf32> to vector<16x32xf32>
    %105 = arith.mulf %95, %104 : vector<16x32xf32>
    %c0_47 = arith.constant 0 : index
    %c0_48 = arith.constant 0 : index
    %106 = vector.load %arg6[%c0_47, %c0_48] : memref<1x32xf32, #tpu.memory_space<vmem>>, vector<1x32xf32>
    %107 = vector.broadcast %106 : vector<1x32xf32> to vector<16x32xf32>
    %108 = arith.mulf %105, %107 : vector<16x32xf32>
    %c0_49 = arith.constant 0 : index
    %c0_50 = arith.constant 0 : index
    %109 = vector.load %arg7[%c0_49, %c0_50] : memref<1x32xf32, #tpu.memory_space<vmem>>, vector<1x32xf32>
    %110 = vector.broadcast %109 : vector<1x32xf32> to vector<16x32xf32>
    %111 = arith.addf %108, %110 : vector<16x32xf32>
    %112 = arith.truncf %111 : vector<16x32xf32> to vector<16x32xbf16>
    %c0_51 = arith.constant 0 : index
    %c0_52 = arith.constant 0 : index
    %113 = vector.load %arg8[%c0_51, %c0_52] : memref<32x32xbf16, #tpu.memory_space<vmem>>, vector<32x32xbf16>
    %cst_53 = arith.constant dense<0.000000e+00> : vector<16x32xf32>
    %114 = tpu.matmul %112, %113, %cst_53 {dimension_numbers = #tpu.dot_dimension_numbers<[1], [0], [0], [1], [0, 0, 1, 1], [], []>} : vector<16x32xbf16>, vector<32x32xbf16>, vector<16x32xf32> -> vector<16x32xf32>
    %c0_54 = arith.constant 0 : index
    %c0_55 = arith.constant 0 : index
    %115 = vector.load %arg9[%c0_54, %c0_55] : memref<1x32xf32, #tpu.memory_space<vmem>>, vector<1x32xf32>
    %116 = vector.broadcast %115 : vector<1x32xf32> to vector<16x32xf32>
    %117 = arith.addf %114, %116 : vector<16x32xf32>
    %cst_56 = arith.constant 0.000000e+00 : f32
    %118 = vector.broadcast %cst_56 : f32 to vector<16x32xf32>
    %119 = arith.maximumf %117, %118 : vector<16x32xf32>
    %120 = arith.truncf %119 : vector<16x32xf32> to vector<16x32xbf16>
    %c0_57 = arith.constant 0 : index
    %c0_58 = arith.constant 0 : index
    %121 = vector.load %arg10[%c0_57, %c0_58] : memref<32x32xbf16, #tpu.memory_space<vmem>>, vector<32x32xbf16>
    %cst_59 = arith.constant dense<0.000000e+00> : vector<16x32xf32>
    %122 = tpu.matmul %120, %121, %cst_59 {dimension_numbers = #tpu.dot_dimension_numbers<[1], [0], [0], [1], [0, 0, 1, 1], [], []>} : vector<16x32xbf16>, vector<32x32xbf16>, vector<16x32xf32> -> vector<16x32xf32>
    %123 = arith.addf %111, %122 : vector<16x32xf32>
    %c0_60 = arith.constant 0 : index
    %c0_61 = arith.constant 0 : index
    %124 = vector.load %arg11[%c0_60, %c0_61] : memref<1x32xf32, #tpu.memory_space<vmem>>, vector<1x32xf32>
    %125 = vector.broadcast %124 : vector<1x32xf32> to vector<16x32xf32>
    %126 = arith.addf %123, %125 : vector<16x32xf32>
    %127 = vector.shape_cast %126 : vector<16x32xf32> to vector<2x8x32xf32>
    %c0_62 = arith.constant 0 : index
    %c0_63 = arith.constant 0 : index
    %c0_64 = arith.constant 0 : index
    %128 = vector.load %arg12[%c0_62, %c0_63, %c0_64] : memref<2x8x32xf32, #tpu.memory_space<vmem>>, vector<2x8x32xf32>
    tpu.vector_store %arg12[%c0_62, %c0_63, %c0_64], %127 {strides = array<i32>} : memref<2x8x32xf32, #tpu.memory_space<vmem>>, vector<2x8x32xf32>,
    return
  }
  func.func @transform_0(%arg0: i32) -> (i32, i32, i32) {
    %c0_i32 = arith.constant 0 : i32
    %c0_i32_0 = arith.constant 0 : i32
    %c0_i32_1 = arith.constant 0 : i32
    return %arg0, %c0_i32, %c0_i32_0 : i32, i32, i32
  }
  func.func @transform_1(%arg0: i32) -> (i32, i32) {
    %c0_i32 = arith.constant 0 : i32
    %c0_i32_0 = arith.constant 0 : i32
    %c0_i32_1 = arith.constant 0 : i32
    return %c0_i32, %c0_i32_0 : i32, i32
  }
  func.func @transform_2(%arg0: i32) -> (i32, i32) {
    %c0_i32 = arith.constant 0 : i32
    %c0_i32_0 = arith.constant 0 : i32
    %c0_i32_1 = arith.constant 0 : i32
    return %c0_i32, %c0_i32_0 : i32, i32
  }
  func.func @transform_3(%arg0: i32) -> (i32, i32) {
    %c0_i32 = arith.constant 0 : i32
    %c0_i32_0 = arith.constant 0 : i32
    %c0_i32_1 = arith.constant 0 : i32
    return %c0_i32, %c0_i32_0 : i32, i32
  }
  func.func @transform_4(%arg0: i32) -> (i32, i32) {
    %c0_i32 = arith.constant 0 : i32
    %c0_i32_0 = arith.constant 0 : i32
    %c0_i32_1 = arith.constant 0 : i32
    return %c0_i32, %c0_i32_0 : i32, i32
  }
  func.func @transform_5(%arg0: i32) -> (i32, i32) {
    %c0_i32 = arith.constant 0 : i32
    %c0_i32_0 = arith.constant 0 : i32
    %c0_i32_1 = arith.constant 0 : i32
    return %c0_i32, %c0_i32_0 : i32, i32
  }
  func.func @transform_6(%arg0: i32) -> (i32, i32) {
    %c0_i32 = arith.constant 0 : i32
    %c0_i32_0 = arith.constant 0 : i32
    %c0_i32_1 = arith.constant 0 : i32
    return %c0_i32, %c0_i32_0 : i32, i32
  }
  func.func @transform_7(%arg0: i32) -> (i32, i32) {
    %c0_i32 = arith.constant 0 : i32
    %c0_i32_0 = arith.constant 0 : i32
    %c0_i32_1 = arith.constant 0 : i32
    return %c0_i32, %c0_i32_0 : i32, i32
  }
  func.func @transform_8(%arg0: i32) -> (i32, i32) {
    %c0_i32 = arith.constant 0 : i32
    %c0_i32_0 = arith.constant 0 : i32
    %c0_i32_1 = arith.constant 0 : i32
    return %c0_i32, %c0_i32_0 : i32, i32
  }
  func.func @transform_9(%arg0: i32) -> (i32, i32) {
    %c0_i32 = arith.constant 0 : i32
    %c0_i32_0 = arith.constant 0 : i32
    %c0_i32_1 = arith.constant 0 : i32
    return %c0_i32, %c0_i32_0 : i32, i32
  }
  func.func @transform_10(%arg0: i32) -> (i32, i32) {
    %c0_i32 = arith.constant 0 : i32
    %c0_i32_0 = arith.constant 0 : i32
    %c0_i32_1 = arith.constant 0 : i32
    return %c0_i32, %c0_i32_0 : i32, i32
  }
  func.func @transform_11(%arg0: i32) -> (i32, i32, i32) {
    %c0_i32 = arith.constant 0 : i32
    %c0_i32_0 = arith.constant 0 : i32
    %c0_i32_1 = arith.constant 0 : i32
    return %arg0, %c0_i32, %c0_i32_0 : i32, i32, i32
  }
  func.func @transform_12(%arg0: i32) -> (i32, i32, i32) {
    %c0_i32 = arith.constant 0 : i32
    %c0_i32_0 = arith.constant 0 : i32
    %c0_i32_1 = arith.constant 0 : i32
    return %arg0, %c0_i32, %c0_i32_0 : i32, i32, i32
  }
}

</mosaic_0001>

<bundles_post_ra>
// kernel: tpu_custom_call.1
= control target key start
LH: loop header
LB: loop body
LE: loop exit
PB: predicated region body
PF: predicated region fallthrough
CT: control target
= control target key end

     0   :  { %18 = vsyncpa [#allocation4], 0  ;;  %s1524_s0 = inlined_call_operand.hbm [shape: f32[2,8,32], index: 0, kind: input, shape index: {}]   ;;  %s1525_s1 = inlined_call_operand.hbm [shape: bf16[32,96], index: 1, kind: input, shape index: {}]   ;;  %s1526_s2 = inlined_call_operand.vmem [shape: f32[1,96], index: 2, kind: input, shape index: {}]   ;;  %s1527_s3 = inlined_call_operand.hbm [shape: bf16[32,32], index: 3, kind: input, shape index: {}]   ;;  %s1528_s4 = inlined_call_operand.vmem [shape: f32[1,32], index: 4, kind: input, shape index: {}]   ;;  %s1529_s5 = inlined_call_operand.vmem [shape: f32[1,32], index: 5, kind: input, shape index: {}]   ;;  %s1530_s6 = inlined_call_operand.vmem [shape: f32[1,32], index: 6, kind: input, shape index: {}]   ;;  %s1531_s7 = inlined_call_operand.hbm [shape: bf16[32,32], index: 7, kind: input, shape index: {}]   ;;  %s1532_s8 = inlined_call_operand.vmem [shape: f32[1,32], index: 8, kind: input, shape index: {}]   ;;  %s1533_s9 = inlined_call_operand.hbm [shape: bf16[32,32], index: 9, kind: input, shape index: {}]   ;;  %s1534_s10 = inlined_call_operand.vmem [shape: f32[1,32], index: 10, kind: input, shape index: {}]   ;;  %s1535_s11 = inlined_call_operand.hbm [shape: f32[2,8,32], index: 11, kind: output, shape index: {0}]   ;;  %s1536_s12 = inlined_call_operand.hbm [shape: f32[2,8,8], index: 12, kind: output, shape index: {1}]  }
   0x1   :  { %19 = vsyncpa [#allocation7], 0 }
   0x2   :  { %20 = vsyncpa [#allocation10], 0 }
   0x3   :  { %21 = vsyncpa [#allocation5], 0  ;;  %s40_s23 = sshll.u32 %s1525_s1, 4  ;;  %s41_s23 = int_to_ptr.hbm [resolvable:$true] %s40_s23 }
   0x4   :  { %22 = vsyncpa [#allocation14], 0  ;;  %s1231_s24 = smov [#allocation6]   ;;  %s74_s28 = sshll.u32 %s1531_s7, 4  ;;  %s75_s28 = int_to_ptr.hbm [resolvable:$true] %s74_s28 }
   0x5   :  { %s42_s25 = sshll.u32 %s1231_s24, 4  ;;  %s1232_s29 = smov 64   ;;  %s43_s25 = int_to_ptr.vmem [resolvable:$true] %s42_s25 }
   0x6   :  { %s1233_s30 = smov 4   ;;  %s1234_s13 = smov [#allocation9]  }
   0x7   :  { %48 = dma.hbm_to_vmem [thread:$0]  %s41_s23, 256, %s43_s25, [#allocation7], %s1232_s29, %s1232_s29, %s1233_s30  }
   0x8   :  { %s76_s14 = sshll.u32 %s1234_s13, 4  ;;  %s27_s16 = sshll.u32 %s1524_s0, 4  ;;  %s77_s14 = int_to_ptr.vmem [resolvable:$true] %s76_s14  ;;  %s28_s16 = int_to_ptr.hbm [resolvable:$true] %s27_s16 }
   0x9   :  { %82 = dma.hbm_to_vmem [thread:$0]  %s75_s28, 256, %s77_s14, [#allocation10], %s1232_s29, %s1232_s29, %s1233_s30  }
   0xa   :  { %s1235_s7 = smov [#allocation3]   ;;  %s55_s20 = sshll.u32 %s1527_s3, 4  ;;  %s56_s20 = int_to_ptr.hbm [resolvable:$true] %s55_s20 }
   0xb   :  { %s29_s17 = sshll.u32 %s1235_s7, 4  ;;  %s1236_s21 = smov 128   ;;  %s30_s17 = int_to_ptr.vmem [resolvable:$true] %s29_s17 }
   0xc   :  { %s1237_s22 = smov 8   ;;  %s1238_s0 = smov [#allocation8]  }
   0xd   :  { %35 = dma.hbm_to_vmem [thread:$0]  %s28_s16, 256, %s30_s17, [#allocation4], %s1236_s21, %s1236_s21, %s1237_s22  }
   0xe   :  { %s57_s23 = sshll.u32 %s1238_s0, 4  ;;  %s89_s26 = sshll.u32 %s1533_s9, 4  ;;  %s58_s23 = int_to_ptr.vmem [resolvable:$true] %s57_s23  ;;  %s90_s26 = int_to_ptr.hbm [resolvable:$true] %s89_s26 }
   0xf   :  { %63 = dma.hbm_to_vmem [thread:$0]  %s56_s20, 256, %s58_s23, [#allocation7], %s1232_s29, %s1232_s29, %s1233_s30  }
  0x10   :  { %s1239_s3 = smov [#allocation11]  }
  0x11   :  { %s91_s27 = sshll.u32 %s1239_s3, 4  ;;  %s92_s27 = int_to_ptr.vmem [resolvable:$true] %s91_s27 }
  0x12   :  { %97 = dma.hbm_to_vmem [thread:$0]  %s90_s26, 256, %s92_s27, [#allocation10], %s1232_s29, %s1232_s29, %s1233_s30  }
  0x13   :  { %1221 = dma.done.wait [#allocation4], 256  }
  0x14   :  { %1222 = vsyncadd [#allocation4], 4294967040 }
  0x15   :  { %1223 = dma.done.wait [#allocation7], 512  }
  0x16   :  { %1224 = vsyncadd [#allocation7], 4294966784 }
  0x17   :  { %1225 = dma.done.wait [#allocation10], 512  }
  0x18   :  { %1226 = vsyncadd [#allocation10], 4294966784  ;;  %v977_v0 = vld [vmem:[#allocation6 + $0x8] sm:$0xff]  ;;  %v976_v1 = vld [vmem:[#allocation6] sm:$0xff]  ;;  %vm144_vm0 = vcmask 261120   ;;  %s1240_s30 = smov 120  }
  0x19   :  { %v1350_v2 = vld [vmem:[#allocation3] sm:$0xff]  ;;  %v1352_v3 = vld [vmem:[#allocation3 + $0x8] sm:$0xff]  ;;  %154 = vmatpush.bf16.msra.mxu0 %v977_v0  ;;  %v1009_v5 = vld [vmem:[%s1526_s2] ss:$0 sm:$0xff]  ;;  %s1241_s13 = smov 88   ;;  %s1242_s14 = smov 96  }
  0x1a   :  { %v123_v4 = vpack.c.bf16 %v1352_v3, %v1350_v2  ;;  %s1243_s2 = smov 112   ;;  %s1244_s15 = smov 80   ;;  %vm169_vm1 = vcmask 64512   ;;  %vm270_vm2 = vcmask 1043456   ;;  %vm310_vm11 = vcmask 60416  }
  0x1b   :  { %s1245_s1 = smov 72   ;;  %s1246_s16 = smov 104   ;;  %vm435_vm12 = vcmask 126016   ;;  %vm560_vm13 = vcmask 191616   ;;  %vm685_vm14 = vcmask 257216  }
  0x1c   :  { %s1247_s7 = smov 56   ;;  %s1249_s17 = smov 40  }
  0x1d   :  { %155 = vmatpush.bf16.msra.mxu0 %v976_v1  ;;  %s1250_s18 = smov 16   ;;  %s1251_s19 = smov 24  }
  0x1e   :  { %s900_s28 = sshll.u32 %s1536_s12, 4  ;;  %s901_s28 = int_to_ptr.hbm [resolvable:$true] %s900_s28 }
  0x20   :  { %928 = vmatmul.msk.bf16.vlgmr.msra.gmra.mxu0 %vm144_vm0, %v123_v4 }
  0x9d   :  { %v157_v6 = vpop.f32.mrf.mxu0 }
  0x9e   :  { %v158_v7 = vadd.f32 %v1009_v5, %v157_v6 }
  0xa0   :  { %v162_v8 = vpack.c.bf16 %v158_v7, %v158_v7 }
  0xa2   :  { %v165_v9 = vunpack.c.l.b16 %v162_v8 }
  0xa4   :  { %v1360_v10 = vpack.c.b16 %v165_v9, %v165_v9 }
  0xa5   :  { %v159_v11 = vpop.f32.mrf.mxu0 }
  0xa6   :  { %v160_v12 = vadd.f32 %v1009_v5, %v159_v11  ;;  %313 = vrot.lane.b32.xlu2 %v1360_v10, %s1240_s30  ;;  %315 = vrot.lane.b32.xlu1 %v1360_v10, %s1241_s13 }
  0xa7   :  { %167 = vrot.lane.b32.xlu0 %v1360_v10, %s1242_s14 }
  0xa8   :  { %v163_v13 = vpack.c.bf16 %v160_v12, %v160_v12 }
  0xaa   :  { %v190_v14 = vunpack.c.l.b16 %v163_v13 }
  0xac   :  { %v1365_v15 = vpack.c.b16 %v190_v14, %v190_v14 }
  0xae   :  { %336 = vrot.lane.b32.xlu2 %v1365_v15, %s1240_s30  ;;  %338 = vrot.lane.b32.xlu1 %v1365_v15, %s1241_s13  ;;  %s1254_s13 = smov [#allocation12]  }
  0xaf   :  { %192 = vrot.lane.b32.xlu0 %v1365_v15, %s1242_s14  ;;  %s885_s14 = sshll.u32 %s1254_s13, 4  ;;  %s886_s14 = int_to_ptr.vmem [resolvable:$true] %s885_s14 }
  0xb6   :  { %438 = vrot.lane.b32.xlu2 %v1360_v10, %s1243_s2  ;;  %463 = vrot.lane.b32.xlu1 %v1365_v15, %s1244_s15 }
  0xb7   :  { %440 = vrot.lane.b32.xlu0 %v1360_v10, %s1244_s15  ;;  %s887_s15 = sshll.u32 %s1535_s11, 4  ;;  %s888_s15 = int_to_ptr.hbm [resolvable:$true] %s887_s15 }
  0xbe   :  { %588 = vrot.lane.b32.xlu2 %v1365_v15, %s1245_s1  ;;  %565 = vrot.lane.b32.xlu1 %v1360_v10, %s1245_s1 }
  0xbf   :  { %461 = vrot.lane.b32.xlu0 %v1365_v15, %s1243_s2 }
  0xc6   :  { %586 = vrot.lane.b32.xlu1 %v1365_v15, %s1246_s16 }
  0xc7   :  { %563 = vrot.lane.b32.xlu0 %v1360_v10, %s1246_s16 }
 0x100   :  { %v314_v16 = vpop.permute.xlu2 %313 }
 0x108   :  { %v337_v21 = vpop.permute.xlu2 %336 }
 0x110   :  { %v439_v26 = vpop.permute.xlu2 %438 }
 0x118   :  { %v316_v17 = vpop.permute.xlu1 %315  ;;  %v589_v31 = vpop.permute.xlu2 %588 }
 0x119   :  { %v168_v18 = vpop.permute.xlu0 %167  ;;  %v321_v19 = vsel %vm169_vm1, %v316_v17, 0  ;;  %v594_v34 = vsel %vm169_vm1, %v589_v31, 0 }
 0x11a   :  { %v174_v20 = vsel %vm169_vm1, %v168_v18, 0  ;;  %330 = vmatpush.bf16.xpose.msrb.mxu0 %v321_v19 }
 0x11b   :  { %183 = vmatpush.bf16.xpose.msra.mxu1 %v174_v20 }
 0x120   :  { %v339_v22 = vpop.permute.xlu1 %338 }
 0x121   :  { %v193_v23 = vpop.permute.xlu0 %192  ;;  %933 = vmatmul.msk.bf16.vlgmr.msrb.gmra.mxu0 %vm169_vm1, %v314_v16  ;;  %v344_v24 = vsel %vm169_vm1, %v339_v22, 0 }
 0x122   :  { %929 = vmatmul.msk.bf16.vlgmr.msra.gmra.mxu1 %vm169_vm1, %v162_v8  ;;  %v198_v25 = vsel %vm169_vm1, %v193_v23, 0 }
 0x123   :  { %207 = vmatpush.bf16.xpose.msra.mxu2 %v198_v25  ;;  %353 = vmatpush.bf16.xpose.msrb.mxu1 %v344_v24 }
 0x128   :  { %v464_v27 = vpop.permute.xlu1 %463 }
 0x129   :  { %v469_v28 = vsel %vm169_vm1, %v464_v27, 0  ;;  %v441_v29 = vpop.permute.xlu0 %440 }
 0x12a   :  { %v446_v30 = vsel %vm169_vm1, %v441_v29, 0  ;;  %930 = vmatmul.msk.bf16.vlgmr.msra.gmra.mxu2 %vm169_vm1, %v163_v13 }
 0x12b   :  { %478 = vmatpush.bf16.xpose.msra.mxu1 %v469_v28  ;;  %455 = vmatpush.bf16.xpose.msra.mxu0 %v446_v30 }
 0x130   :  { %v566_v32 = vpop.permute.xlu1 %565 }
 0x131   :  { %v571_v33 = vsel %vm169_vm1, %v566_v32, 0  ;;  %v462_v35 = vpop.permute.xlu0 %461 }
 0x132   :  { %934 = vmatmul.msk.bf16.vlgmr.msrb.gmra.mxu1 %vm169_vm1, %v337_v21  ;;  %937 = vmatmul.msk.bf16.vlgmr.msra.gmra.mxu0 %vm169_vm1, %v439_v26 }
 0x133   :  { %603 = vmatpush.bf16.xpose.msrb.mxu1 %v594_v34  ;;  %580 = vmatpush.bf16.xpose.msrb.mxu0 %v571_v33 }
 0x138   :  { %v587_v37 = vpop.permute.xlu1 %586 }
 0x139   :  { %v564_v36 = vpop.permute.xlu0 %563 }
 0x142   :  { %938 = vmatmul.msk.bf16.vlgmr.msra.gmra.mxu1 %vm169_vm1, %v462_v35  ;;  %941 = vmatmul.msk.bf16.vlgmr.msrb.gmra.mxu0 %vm169_vm1, %v564_v36 }
 0x152   :  { %942 = vmatmul.msk.bf16.vlgmr.msrb.gmra.mxu1 %vm169_vm1, %v587_v37 }
 0x19e   :  { %v332_v38 = vpop.f32.mrf.mxu0 }
 0x19f   :  { %v185_v39 = vpop.f32.mrf.mxu1  ;;  %v359_v40 = vsel %vm169_vm1, %v332_v38, -inf }
 0x1a0   :  { %360 = vmax.xlane.f32.xlu1 %v359_v40  ;;  %v213_v41 = vsel %vm169_vm1, %v185_v39, -inf }
 0x1a1   :  { %214 = vmax.xlane.f32.xlu2 %v213_v41 }
 0x1a6   :  { %v334_v42 = vpop.f32.mrf.mxu0 }
 0x1a7   :  { %v187_v43 = vpop.f32.mrf.mxu1 }
 0x1ad   :  { %v209_v44 = vpop.f32.mrf.mxu2 }
 0x1ae   :  { %v216_v45 = vsel %vm169_vm1, %v209_v44, -inf }
 0x1af   :  { %v355_v46 = vpop.f32.mrf.mxu1  ;;  %217 = vmax.xlane.f32.xlu0 %v216_v45  ;;  %v457_v47 = vpop.f32.mrf.mxu0 }
 0x1b0   :  { %v362_v48 = vsel %vm169_vm1, %v355_v46, -inf  ;;  %v484_v50 = vsel %vm169_vm1, %v457_v47, -inf }
 0x1b1   :  { %363 = vmax.xlane.f32.xlu2 %v362_v48 }
 0x1b5   :  { %v211_v49 = vpop.f32.mrf.mxu2 }
 0x1b7   :  { %v357_v51 = vpop.f32.mrf.mxu1  ;;  %485 = vmax.xlane.f32.xlu0 %v484_v50  ;;  %v459_v52 = vpop.f32.mrf.mxu0 }
 0x1b9   :  { %287 = vrot.lane.b32.xlu1 %v1365_v15, %s1232_s29 }
 0x1bf   :  { %v1401_v53 = vpop.f32.mrf.mxu1  ;;  %v1403_v54 = vpop.f32.mrf.mxu0 }
 0x1c0   :  { %v487_v60 = vsel %vm169_vm1, %v1401_v53, -inf  ;;  %v609_v61 = vsel %vm169_vm1, %v1403_v54, -inf }
 0x1c7   :  { %v482_v55 = vpop.f32.mrf.mxu1  ;;  %v584_v56 = vpop.f32.mrf.mxu0 }
 0x1cb   :  { %265 = vrot.lane.b32.xlu0 %v1360_v10, %s1232_s29  ;;  %s1248_s29 = smov 48  }
 0x1cf   :  { %v1407_v57 = vpop.f32.mrf.mxu1 }
 0x1d0   :  { %v612_v58 = vsel %vm169_vm1, %v1407_v57, -inf }
 0x1d1   :  { %613 = vmax.xlane.f32.xlu2 %v612_v58 }
 0x1d7   :  { %v607_v59 = vpop.f32.mrf.mxu1 }
 0x1e3   :  { %488 = vmax.xlane.f32.xlu1 %v487_v60 }
 0x1eb   :  { %610 = vmax.xlane.f32.xlu1 %v609_v61 }
 0x204   :  { %404 = vrot.lane.b32.xlu1 %v1365_v15, %s1247_s7 }
 0x213   :  { %v361_v62 = vpop.xlane.xlu1 %360 }
 0x214   :  { %v215_v63 = vpop.xlane.xlu2 %214  ;;  %v365_v1 = vsub.f32 %v332_v38, %v361_v62 }
 0x215   :  { %v219_v0 = vsub.f32 %v185_v39, %v215_v63 }
 0x216   :  { %v367_v5 = vmul.f32 1.442695, %v365_v1 }
 0x217   :  { %v221_v4 = vmul.f32 1.442695, %v219_v0 }
 0x219   :  { %1015 = vpow2.f32 %v221_v4 }
 0x21a   :  { %1017 = vpow2.f32 %v367_v5 }
 0x21f   :  { %v1417_v6 = vpop.eup %1015 }
 0x220   :  { %v225_v7 = vsel %vm169_vm1, %v1417_v6, 0.0  ;;  %v1421_v12 = vpop.eup %1017 }
 0x221   :  { %226 = vadd.xlane.f32.xlu2 %v225_v7  ;;  %v371_v17 = vsel %vm169_vm1, %v1421_v12, 0.0 }
 0x222   :  { %v218_v8 = vpop.xlane.xlu0 %217 }
 0x223   :  { %v220_v9 = vsub.f32 %v209_v44, %v218_v8 }
 0x224   :  { %v364_v11 = vpop.xlane.xlu2 %363 }
 0x225   :  { %v223_v13 = vmul.f32 1.442695, %v220_v9  ;;  %v366_v14 = vsub.f32 %v355_v46, %v364_v11 }
 0x227   :  { %1019 = vpow2.f32 %v223_v13  ;;  %v369_v16 = vmul.f32 1.442695, %v366_v14 }
 0x229   :  { %1021 = vpow2.f32 %v369_v16  ;;  %372 = vadd.xlane.f32.xlu2 %v371_v17 }
 0x22a   :  { %v486_v18 = vpop.xlane.xlu0 %485 }
 0x22b   :  { %v490_v19 = vsub.f32 %v457_v47, %v486_v18  ;;  %v288_v27 = vpop.permute.xlu1 %287 }
 0x22c   :  { %v293_v30 = vsel %vm270_vm2, %v288_v27, 0 }
 0x22d   :  { %v1425_v20 = vpop.eup %1019  ;;  %v492_v21 = vmul.f32 1.442695, %v490_v19 }
 0x22e   :  { %v228_v24 = vsel %vm169_vm1, %v1425_v20, 0.0 }
 0x22f   :  { %v1427_v22 = vpop.eup %1021  ;;  %1023 = vpow2.f32 %v492_v21 }
 0x230   :  { %v374_v23 = vsel %vm169_vm1, %v1427_v22, 0.0 }
 0x231   :  { %375 = vadd.xlane.f32.xlu0 %v374_v23  ;;  %229 = vadd.xlane.f32.xlu2 %v228_v24 }
 0x235   :  { %v1433_v25 = vpop.eup %1023 }
 0x236   :  { %v496_v26 = vsel %vm169_vm1, %v1433_v25, 0.0 }
 0x237   :  { %497 = vadd.xlane.f32.xlu1 %v496_v26 }
 0x23d   :  { %v266_v28 = vpop.permute.xlu0 %265 }
 0x23e   :  { %v272_v29 = vsel %vm270_vm2, %v266_v28, 0 }
 0x23f   :  { %281 = vmatpush.bf16.msra.mxu3 %v272_v29 }
 0x243   :  { %302 = vmatpush.bf16.msrb.mxu3 %v293_v30 }
 0x244   :  { %v614_v37 = vpop.xlane.xlu2 %613 }
 0x245   :  { %508 = vrot.lane.b32.xlu0 %v1360_v10, %s1248_s29  ;;  %v616_v38 = vsub.f32 %v1407_v57, %v614_v37 }
 0x249   :  { %383 = vrot.lane.b32.xlu2 %v1360_v10, %s1247_s7 }
 0x24d   :  { %529 = vrot.lane.b32.xlu0 %v1365_v15, %s1248_s29 }
 0x255   :  { %633 = vrot.lane.b32.xlu0 %v1360_v10, %s1249_s17  ;;  %v619_v10 = vmul.f32 1.442695, %v616_v38 }
 0x256   :  { %v489_v31 = vpop.xlane.xlu1 %488 }
 0x257   :  { %v491_v34 = vsub.f32 %v1401_v53, %v489_v31 }
 0x259   :  { %v494_v36 = vmul.f32 1.442695, %v491_v34 }
 0x25e   :  { %v611_v32 = vpop.xlane.xlu1 %610 }
 0x25f   :  { %v615_v33 = vsub.f32 %v1403_v54, %v611_v32 }
 0x261   :  { %v617_v35 = vmul.f32 1.442695, %v615_v33 }
 0x263   :  { %1025 = vpow2.f32 %v617_v35 }
 0x264   :  { %1027 = vpow2.f32 %v494_v36 }
 0x265   :  { %1029 = vpow2.f32 %v619_v10 }
 0x269   :  { %v1447_v39 = vpop.eup %1025 }
 0x26a   :  { %v621_v40 = vsel %vm169_vm1, %v1447_v39, 0.0  ;;  %v1451_v41 = vpop.eup %1027 }
 0x26b   :  { %622 = vadd.xlane.f32.xlu1 %v621_v40  ;;  %v499_v42 = vsel %vm169_vm1, %v1451_v41, 0.0  ;;  %v1455_v43 = vpop.eup %1029 }
 0x26c   :  { %v624_v44 = vsel %vm169_vm1, %v1455_v43, 0.0 }
 0x272   :  { %500 = vadd.xlane.f32.xlu2 %v499_v42 }
 0x276   :  { %v405_v57 = vpop.permute.xlu1 %404 }
 0x277   :  { %v410_v62 = vsel %vm270_vm2, %v405_v57, 0 }
 0x27a   :  { %625 = vadd.xlane.f32.xlu2 %v624_v44 }
 0x284   :  { %654 = vrot.lane.b32.xlu1 %v1365_v15, %s1249_s17 }
 0x294   :  { %v227_v45 = vpop.xlane.xlu2 %226 }
 0x295   :  { %1031 = vrcp.f32 %v227_v45  ;;  %v242_v51 = vand.u32 2147483648, %v227_v45  ;;  %v240_v52 = vand.u32 2147483647, %v227_v45  ;;  %vm236_vm4 = vweird.f32 %v227_v45 }
 0x297   :  { %v243_v54 = vor.u32 1.1754944e-38, %v242_v51  ;;  %vm241_vm6 = vcmp.eq.f32.partialorder %v240_v52, 8.507059e+37 }
 0x29b   :  { %v1032_v46 = vpop.eup %1031 }
 0x29c   :  { %v232_v47 = vmul.f32 %v1032_v46, %v227_v45  ;;  %v373_v48 = vpop.xlane.xlu2 %372  ;;  %vm237_vm3 = vweird.f32 %v1032_v46 }
 0x29d   :  { %1033 = vrcp.f32 %v373_v48  ;;  %vm238_vm5 = vmor %vm236_vm4, %vm237_vm3 }
 0x29e   :  { %v233_v49 = vsub.f32 1.0, %v232_v47 }
 0x2a0   :  { %v234_v50 = vmul.f32 %v1032_v46, %v233_v49 }
 0x2a2   :  { %v235_v53 = vadd.f32 %v1032_v46, %v234_v50 }
 0x2a3   :  { %v1034_v59 = vpop.eup %1033 }
 0x2a4   :  { %v230_v55 = vpop.xlane.xlu2 %229  ;;  %v239_v56 = vsel %vm238_vm5, %v1032_v46, %v235_v53  ;;  %v379_v63 = vmul.f32 %v1034_v59, %v1421_v12 }
 0x2a5   :  { %1035 = vrcp.f32 %v230_v55  ;;  %v244_v15 = vsel %vm241_vm6, %v243_v54, %v239_v56  ;;  %v257_v7 = vand.u32 2147483648, %v230_v55  ;;  %v255_v13 = vand.u32 2147483647, %v230_v55 }
 0x2a6   :  { %v245_v58 = vmul.f32 %v1417_v6, %v244_v15  ;;  %v376_v6 = vpop.xlane.xlu0 %375  ;;  %v381_v9 = vpack.c.bf16 %v379_v63, %v379_v63  ;;  %vm251_vm8 = vweird.f32 %v230_v55 }
 0x2a7   :  { %v258_v12 = vor.u32 1.1754944e-38, %v257_v7  ;;  %vm256_vm10 = vcmp.eq.f32.partialorder %v255_v13, 8.507059e+37 }
 0x2a8   :  { %v263_v60 = vpack.c.bf16 %v245_v58, %v245_v58  ;;  %261 = vst.msk [vmem:[#allocation13] sm:$0xff] %vm169_vm1, %v245_v58 }
 0x2aa   :  { %931 = vmatmul.msk.bf16.vlgmr.msra.gmra.mxu3 %vm169_vm1, %v263_v60  ;;  %v498_v8 = vpop.xlane.xlu1 %497 }
 0x2ab   :  { %v1036_v61 = vpop.eup %1035  ;;  %419 = vmatpush.bf16.msra.mxu3 %v410_v62  ;;  %1037 = vrcp.f32 %v498_v8 }
 0x2ac   :  { %v247_v0 = vmul.f32 %v1036_v61, %v230_v55  ;;  %v384_v1 = vpop.permute.xlu2 %383  ;;  %vm252_vm7 = vweird.f32 %v1036_v61  ;;  %1039 = vrcp.f32 %v376_v6 }
 0x2ad   :  { %v389_v4 = vsel %vm270_vm2, %v384_v1, 0  ;;  %vm253_vm9 = vmor %vm251_vm8, %vm252_vm7 }
 0x2ae   :  { %v248_v5 = vsub.f32 1.0, %v247_v0  ;;  %398 = vmatpush.bf16.msrb.mxu2 %v389_v4 }
 0x2b0   :  { %v249_v11 = vmul.f32 %v1036_v61, %v248_v5 }
 0x2b1   :  { %935 = vmatmul.msk.bf16.vlgmr.msrb.gmra.mxu2 %vm169_vm1, %v381_v9  ;;  %v1038_v21 = vpop.eup %1037  ;;  %v980_v9 = vld [vmem:[#allocation8 + $0x8] sm:$0xff] }
 0x2b2   :  { %v250_v14 = vadd.f32 %v1036_v61, %v249_v11  ;;  %v504_v26 = vmul.f32 %v1038_v21, %v1433_v25  ;;  %724 = vmatpush.bf16.msra.mxu0 %v980_v9  ;;  %v979_v11 = vld [vmem:[#allocation8] sm:$0xff] }
 0x2b3   :  { %v983_v9 = vld [vmem:[#allocation11] sm:$0xff] }
 0x2b4   :  { %v254_v16 = vsel %vm253_vm9, %v1036_v61, %v250_v14  ;;  %v506_v27 = vpack.c.bf16 %v504_v26, %v504_v26 }
 0x2b5   :  { %v259_v17 = vsel %vm256_vm10, %v258_v12, %v254_v16 }
 0x2b6   :  { %v260_v18 = vmul.f32 %v1425_v20, %v259_v17  ;;  %v1040_v20 = vpop.eup %1039  ;;  %725 = vmatpush.bf16.msra.mxu0 %v979_v11  ;;  %v1010_v17 = vld [vmem:[%s1528_s4] ss:$0 sm:$0xff] }
 0x2b7   :  { %v509_v19 = vpop.permute.xlu0 %508  ;;  %v380_v30 = vmul.f32 %v1040_v20, %v1427_v22 }
 0x2b8   :  { %v514_v23 = vsel %vm270_vm2, %v509_v19, 0  ;;  %v264_v24 = vpack.c.bf16 %v260_v18, %v260_v18  ;;  %262 = vst.msk [vmem:[#allocation13 + $0x8] sm:$0xff] %vm169_vm1, %v260_v18 }
 0x2b9   :  { %523 = vmatpush.bf16.msra.mxu2 %v514_v23  ;;  %v382_v33 = vpack.c.bf16 %v380_v30, %v380_v30 }
 0x2ba   :  { %932 = vmatmul.msk.bf16.vlgmr.msrb.gmra.mxu3 %vm169_vm1, %v264_v24 }
 0x2bf   :  { %v530_v28 = vpop.permute.xlu0 %529 }
 0x2c0   :  { %v535_v29 = vsel %vm270_vm2, %v530_v28, 0 }
 0x2c1   :  { %939 = vmatmul.msk.bf16.vlgmr.msra.gmra.mxu2 %vm169_vm1, %v506_v27  ;;  %544 = vmatpush.bf16.msrb.mxu3 %v535_v29  ;;  %v1252_v29 = vmov 32.0  }
 0x2c7   :  { %v634_v31 = vpop.permute.xlu0 %633 }
 0x2c8   :  { %v639_v32 = vsel %vm270_vm2, %v634_v31, 0 }
 0x2c9   :  { %648 = vmatpush.bf16.msrb.mxu2 %v639_v32 }
 0x2ca   :  { %936 = vmatmul.msk.bf16.vlgmr.msra.gmra.mxu3 %vm169_vm1, %v382_v33 }
 0x2de   :  { %v623_v25 = vpop.xlane.xlu1 %622 }
 0x2df   :  { %1041 = vrcp.f32 %v623_v25 }
 0x2e5   :  { %v1042_v34 = vpop.eup %1041  ;;  %v501_v35 = vpop.xlane.xlu2 %500 }
 0x2e6   :  { %v629_v36 = vmul.f32 %v1042_v34, %v1447_v39  ;;  %1043 = vrcp.f32 %v501_v35 }
 0x2e8   :  { %v631_v37 = vpack.c.bf16 %v629_v36, %v629_v36 }
 0x2ea   :  { %943 = vmatmul.msk.bf16.vlgmr.msrb.gmra.mxu2 %vm169_vm1, %v631_v37 }
 0x2ec   :  { %v1044_v38 = vpop.eup %1043 }
 0x2ed   :  { %v505_v22 = vmul.f32 %v1044_v38, %v1451_v41  ;;  %v626_v10 = vpop.xlane.xlu2 %625 }
 0x2ee   :  { %1045 = vrcp.f32 %v626_v10 }
 0x2ef   :  { %v507_v40 = vpack.c.bf16 %v505_v22, %v505_v22  ;;  %1047 = vrcp.f32 %v1252_v29 }
 0x2f1   :  { %940 = vmatmul.msk.bf16.vlgmr.msrb.gmra.mxu3 %vm169_vm1, %v507_v40 }
 0x2f4   :  { %v1046_v45 = vpop.eup %1045 }
 0x2f5   :  { %v630_v46 = vmul.f32 %v1046_v45, %v1455_v43  ;;  %v1048_v20 = vpop.eup %1047 }
 0x2f6   :  { %v655_v42 = vpop.permute.xlu1 %654  ;;  %v741_v30 = vmul.f32 32.0, %v1048_v20  ;;  %vm745_vm15 = vweird.f32 %v1048_v20 }
 0x2f7   :  { %v660_v44 = vsel %vm270_vm2, %v655_v42, 0  ;;  %v632_v39 = vpack.c.bf16 %v630_v46, %v630_v46 }
 0x2f8   :  { %669 = vmatpush.bf16.msra.mxu3 %v660_v44  ;;  %v742_v31 = vsub.f32 1.0, %v741_v30  ;;  %v982_v44 = vld [vmem:[#allocation9 + $0x8] sm:$0xff] }
 0x2f9   :  { %827 = vmatpush.bf16.msra.mxu1 %v982_v44 }
 0x2fa   :  { %v743_v32 = vmul.f32 %v1048_v20, %v742_v31 }
 0x2fc   :  { %v744_v33 = vadd.f32 %v1048_v20, %v743_v32 }
 0x2fe   :  { %v746_v25 = vsel %vm745_vm15, %v1048_v20, %v744_v33 }
 0x301   :  { %944 = vmatmul.msk.bf16.vlgmr.msra.gmra.mxu3 %vm169_vm1, %v632_v39  ;;  %v981_v39 = vld [vmem:[#allocation9] sm:$0xff] }
 0x302   :  { %828 = vmatpush.bf16.msra.mxu1 %v981_v39 }
 0x32d   :  { %v283_v47 = vpop.f32.mrf.mxu3 }
 0x32e   :  { %v308_v48 = vpack.c.bf16 %v283_v47, %v283_v47 }
 0x330   :  { %311 = vst.msk [vmem:[#allocation2] sm:$0xf] %vm310_vm11, %v308_v48 }
 0x334   :  { %v400_v41 = vpop.f32.mrf.mxu2 }
 0x335   :  { %v425_v49 = vpack.c.bf16 %v400_v41, %v400_v41  ;;  %v285_v50 = vpop.f32.mrf.mxu3 }
 0x337   :  { %429 = vrot.lane.b32.xlu2 %v425_v49, %s1237_s22 }
 0x33c   :  { %v402_v51 = vpop.f32.mrf.mxu2 }
 0x33d   :  { %v304_v52 = vpop.f32.mrf.mxu3 }
 0x33e   :  { %v309_v53 = vpack.c.bf16 %v304_v52, %v304_v52 }
 0x340   :  { %312 = vst.msk [vmem:[#allocation2 + $0x4] sm:$0xf] %vm310_vm11, %v309_v53 }
 0x344   :  { %v525_v54 = vpop.f32.mrf.mxu2 }
 0x345   :  { %v550_v55 = vpack.c.bf16 %v525_v54, %v525_v54  ;;  %v306_v56 = vpop.f32.mrf.mxu3 }
 0x347   :  { %554 = vrot.lane.b32.xlu0 %v550_v55, %s1250_s18 }
 0x34c   :  { %v527_v43 = vpop.f32.mrf.mxu2 }
 0x34d   :  { %v421_v15 = vpop.f32.mrf.mxu3 }
 0x34e   :  { %v426_v57 = vpack.c.bf16 %v421_v15, %v421_v15 }
 0x350   :  { %431 = vrot.lane.b32.xlu0 %v426_v57, %s1237_s22 }
 0x355   :  { %v423_v58 = vpop.f32.mrf.mxu3 }
 0x36d   :  { %v650_v59 = vpop.f32.mrf.mxu2 }
 0x36e   :  { %v675_v60 = vpack.c.bf16 %v650_v59, %v650_v59  ;;  %v1011_v59 = vld [vmem:[%s1529_s5] ss:$0 sm:$0xff] }
 0x370   :  { %679 = vrot.lane.b32.xlu1 %v675_v60, %s1251_s19 }
 0x374   :  { %v546_v61 = vpop.f32.mrf.mxu3 }
 0x375   :  { %v551_v62 = vpack.c.bf16 %v546_v61, %v546_v61  ;;  %v652_v63 = vpop.f32.mrf.mxu2 }
 0x376   :  { %v1012_v63 = vld [vmem:[%s1530_s6] ss:$0 sm:$0xff]  ;;  %s1253_s6 = smov [#allocation13]  }
 0x377   :  { %556 = vrot.lane.b32.xlu0 %v551_v62, %s1250_s18  ;;  %s898_s3 = sshll.u32 %s1253_s6, 4  ;;  %s899_s3 = int_to_ptr.vmem [resolvable:$true] %s898_s3 }
 0x378   :  { %906 = dma.vmem_to_hbm [thread:$0]  %s899_s3, 256, %s901_s28, [#allocation14], %s1236_s21, %s1236_s21, %s1237_s22  }
 0x37c   :  { %v548_v0 = vpop.f32.mrf.mxu3 }
 0x384   :  { %v671_v1 = vpop.f32.mrf.mxu3 }
 0x385   :  { %v676_v4 = vpack.c.bf16 %v671_v1, %v671_v1 }
 0x387   :  { %681 = vrot.lane.b32.xlu2 %v676_v4, %s1251_s19 }
 0x38c   :  { %v673_v5 = vpop.f32.mrf.mxu3 }
 0x391   :  { %v430_v7 = vpop.permute.xlu2 %429 }
 0x392   :  { %436 = vst.msk [vmem:[#allocation2] sm:$0xf] %vm435_vm12, %v430_v7 }
 0x3b9   :  { %v555_v6 = vpop.permute.xlu0 %554 }
 0x3ba   :  { %561 = vst.msk [vmem:[#allocation2] sm:$0xf] %vm560_vm13, %v555_v6 }
 0x3c2   :  { %v432_v8 = vpop.permute.xlu0 %431 }
 0x3c3   :  { %437 = vst.msk [vmem:[#allocation2 + $0x4] sm:$0xf] %vm435_vm12, %v432_v8  ;;  %v984_v8 = vld [vmem:[#allocation11 + $0x8] sm:$0xff] }
 0x3c4   :  { %863 = vmatpush.bf16.msra.mxu2 %v984_v8 }
 0x3c8   :  { %864 = vmatpush.bf16.msra.mxu2 %v983_v9 }
 0x3e1   :  { %v682_v12 = vpop.permute.xlu2 %681 }
 0x3e2   :  { %v680_v13 = vpop.permute.xlu1 %679 }
 0x3e3   :  { %686 = vst.msk [vmem:[#allocation2] sm:$0xf] %vm685_vm14, %v680_v13  ;;  %v1013_v13 = vld [vmem:[%s1532_s8] ss:$0 sm:$0xff] }
 0x3e9   :  { %v557_v14 = vpop.permute.xlu0 %556 }
 0x3ea   :  { %562 = vst.msk [vmem:[#allocation2 + $0x4] sm:$0xf] %vm560_vm13, %v557_v14 }
 0x3eb   :  { %687 = vst.msk [vmem:[#allocation2 + $0x4] sm:$0xf] %vm685_vm14, %v682_v12 }
 0x3f2   :  { %v978_v16 = vld [vmem:[#allocation2] sm:$0xff] }
 0x3f3   :  { %957 = vmatmul.msk.bf16.vlgmr.msra.gmra.mxu0 %vm144_vm0, %v978_v16 }
 0x470   :  { %v727_v18 = vpop.f32.mrf.mxu0 }
 0x471   :  { %v728_v19 = vadd.f32 %v1010_v17, %v727_v18 }
 0x473   :  { %v732_v21 = vadd.f32 %v728_v19, %v1350_v2 }
 0x475   :  { %v734_v23 = vsel %vm144_vm0, %v732_v21, 0.0 }
 0x476   :  { %735 = vadd.xlane.f32.xlu0 %v734_v23 }
 0x478   :  { %v729_v24 = vpop.f32.mrf.mxu0 }
 0x479   :  { %v730_v26 = vadd.f32 %v1010_v17, %v729_v24 }
 0x47b   :  { %v733_v27 = vadd.f32 %v730_v26, %v1352_v3 }
 0x47d   :  { %v737_v28 = vsel %vm144_vm0, %v733_v27, 0.0 }
 0x47e   :  { %738 = vadd.xlane.f32.xlu1 %v737_v28 }
 0x4e9   :  { %v736_v2 = vpop.xlane.xlu0 %735 }
 0x4ea   :  { %v747_v34 = vmul.f32 %v746_v25, %v736_v2 }
 0x4ec   :  { %v749_v35 = vsub.f32 %v732_v21, %v747_v34  ;;  %v1014_v21 = vld [vmem:[%s1534_s10] ss:$0 sm:$0xff] }
 0x4ee   :  { %v751_v36 = vmul.f32 %v749_v35, %v749_v35 }
 0x4f0   :  { %v753_v37 = vsel %vm144_vm0, %v751_v36, 0.0 }
 0x4f1   :  { %v739_v38 = vpop.xlane.xlu1 %738  ;;  %754 = vadd.xlane.f32.xlu2 %v753_v37 }
 0x4f2   :  { %v748_v3 = vmul.f32 %v746_v25, %v739_v38 }
 0x4f4   :  { %v750_v22 = vsub.f32 %v733_v27, %v748_v3 }
 0x4f6   :  { %v752_v40 = vmul.f32 %v750_v22, %v750_v22 }
 0x4f8   :  { %v756_v10 = vsel %vm144_vm0, %v752_v40, 0.0 }
 0x4f9   :  { %757 = vadd.xlane.f32.xlu0 %v756_v10 }
 0x564   :  { %v755_v42 = vpop.xlane.xlu2 %754 }
 0x565   :  { %v759_v45 = vmul.f32 %v755_v42, %v746_v25 }
 0x567   :  { %v761_v46 = vadd.f32 1e-05, %v759_v45 }
 0x569   :  { %1049 = vrsqrt.f32 %v761_v46  ;;  %vm769_vm2 = vweird.f32 %v761_v46 }
 0x56c   :  { %v758_v47 = vpop.xlane.xlu0 %757 }
 0x56d   :  { %v760_v48 = vmul.f32 %v758_v47, %v746_v25 }
 0x56f   :  { %v1050_v41 = vpop.eup %1049  ;;  %v762_v49 = vadd.f32 1e-05, %v760_v48 }
 0x570   :  { %v764_v50 = vmul.f32 %v1050_v41, %v761_v46  ;;  %vm770_vm1 = vweird.f32 %v1050_v41 }
 0x571   :  { %1051 = vrsqrt.f32 %v762_v49  ;;  %vm771_vm3 = vmor %vm769_vm2, %vm770_vm1  ;;  %vm779_vm5 = vweird.f32 %v762_v49 }
 0x572   :  { %v765_v51 = vmul.f32 %v1050_v41, %v764_v50 }
 0x574   :  { %v766_v52 = vmul.f32 0.5, %v765_v51 }
 0x576   :  { %v767_v53 = vsub.f32 1.5, %v766_v52 }
 0x577   :  { %v1052_v54 = vpop.eup %1051 }
 0x578   :  { %v768_v55 = vmul.f32 %v1050_v41, %v767_v53  ;;  %v774_v56 = vmul.f32 %v1052_v54, %v762_v49  ;;  %vm780_vm4 = vweird.f32 %v1052_v54 }
 0x579   :  { %vm781_vm6 = vmor %vm779_vm5, %vm780_vm4 }
 0x57a   :  { %v775_v43 = vmul.f32 %v1052_v54, %v774_v56  ;;  %v772_v15 = vsel %vm771_vm3, %v1050_v41, %v768_v55 }
 0x57b   :  { %v783_v60 = vmul.f32 %v772_v15, %v749_v35 }
 0x57c   :  { %v776_v57 = vmul.f32 0.5, %v775_v43 }
 0x57d   :  { %v789_v0 = vmul.f32 %v1011_v59, %v783_v60 }
 0x57e   :  { %v777_v58 = vsub.f32 1.5, %v776_v57 }
 0x57f   :  { %v795_v5 = vadd.f32 %v1012_v63, %v789_v0 }
 0x580   :  { %v778_v61 = vmul.f32 %v1052_v54, %v777_v58 }
 0x582   :  { %v782_v62 = vsel %vm781_vm6, %v1052_v54, %v778_v61 }
 0x583   :  { %v784_v1 = vmul.f32 %v782_v62, %v750_v22 }
 0x585   :  { %v790_v4 = vmul.f32 %v1011_v59, %v784_v1 }
 0x587   :  { %v796_v7 = vadd.f32 %v1012_v63, %v790_v4 }
 0x589   :  { %v797_v6 = vpack.c.bf16 %v796_v7, %v795_v5 }
 0x58b   :  { %966 = vmatmul.msk.bf16.vlgmr.msra.gmra.mxu1 %vm144_vm0, %v797_v6 }
 0x608   :  { %v830_v11 = vpop.f32.mrf.mxu1 }
 0x609   :  { %v831_v14 = vadd.f32 %v1013_v13, %v830_v11 }
 0x60b   :  { %v835_v17 = vmax.f32 %v831_v14, 0.0 }
 0x610   :  { %v832_v12 = vpop.f32.mrf.mxu1 }
 0x611   :  { %v833_v16 = vadd.f32 %v1013_v13, %v832_v12 }
 0x613   :  { %v836_v18 = vmax.f32 %v833_v16, 0.0 }
 0x615   :  { %v837_v19 = vpack.c.bf16 %v836_v18, %v835_v17 }
 0x617   :  { %975 = vmatmul.msk.bf16.vlgmr.msra.gmra.mxu2 %vm144_vm0, %v837_v19 }
 0x69a   :  { %v866_v23 = vpop.f32.mrf.mxu2 }
 0x69b   :  { %v871_v24 = vadd.f32 %v866_v23, %v795_v5 }
 0x69d   :  { %v877_v26 = vadd.f32 %v1014_v21, %v871_v24 }
 0x69f   :  { %879 = vst.msk [vmem:[#allocation12] sm:$0xff] %vm144_vm0, %v877_v26 }
 0x6a2   :  { %v868_v27 = vpop.f32.mrf.mxu2 }
 0x6a3   :  { %v872_v28 = vadd.f32 %v868_v27, %v796_v7 }
 0x6a5   :  { %v878_v29 = vadd.f32 %v1014_v21, %v872_v28 }
 0x6a7   :  { %880 = vst.msk [vmem:[#allocation12 + $0x8] sm:$0xff] %vm144_vm0, %v878_v29 }
 0x6a8   :  { %893 = dma.vmem_to_hbm [thread:$0]  %s886_s14, 256, %s888_s15, [#allocation5], %s1236_s21, %s1236_s21, %s1237_s22  }
 0x6a9   :  { %1227 = dma.done.wait [#allocation5], 256  }
 0x6aa   :  { %1228 = vsyncadd [#allocation5], 4294967040 }
 0x6ab   :  { %1229 = dma.done.wait [#allocation14], 256  }
 0x6ac   :  { %1230 = vsyncadd [#allocation14], 4294967040 }
 0x6ad   :  { %915 = vsyncpa [#allocation4], 1 }
 0x6ae   :  { %916 = vsyncpa [#allocation7], 1 }
 0x6af   :  { %917 = vsyncpa [#allocation10], 1 }
 0x6b0   :  { %918 = vsyncpa [#allocation5], 1 }
 0x6b1   :  { %919 = vsyncpa [#allocation14], 1 }

// kernel: tpu_custom_call.1
= control target key start
LH: loop header
LB: loop body
LE: loop exit
PB: predicated region body
PF: predicated region fallthrough
CT: control target
= control target key end

     0   :  { %18 = vsyncpa [#allocation4], 0  ;;  %s1524_s0 = inlined_call_operand.hbm [shape: f32[2,8,32], index: 0, kind: input, shape index: {}]   ;;  %s1525_s1 = inlined_call_operand.hbm [shape: bf16[32,96], index: 1, kind: input, shape index: {}]   ;;  %s1526_s2 = inlined_call_operand.vmem [shape: f32[1,96], index: 2, kind: input, shape index: {}]   ;;  %s1527_s3 = inlined_call_operand.hbm [shape: bf16[32,32], index: 3, kind: input, shape index: {}]   ;;  %s1528_s4 = inlined_call_operand.vmem [shape: f32[1,32], index: 4, kind: input, shape index: {}]   ;;  %s1529_s5 = inlined_call_operand.vmem [shape: f32[1,32], index: 5, kind: input, shape index: {}]   ;;  %s1530_s6 = inlined_call_operand.vmem [shape: f32[1,32], index: 6, kind: input, shape index: {}]   ;;  %s1531_s7 = inlined_call_operand.hbm [shape: bf16[32,32], index: 7, kind: input, shape index: {}]   ;;  %s1532_s8 = inlined_call_operand.vmem [shape: f32[1,32], index: 8, kind: input, shape index: {}]   ;;  %s1533_s9 = inlined_call_operand.hbm [shape: bf16[32,32], index: 9, kind: input, shape index: {}]   ;;  %s1534_s10 = inlined_call_operand.vmem [shape: f32[1,32], index: 10, kind: input, shape index: {}]   ;;  %s1535_s11 = inlined_call_operand.hbm [shape: f32[2,8,32], index: 11, kind: output, shape index: {0}]   ;;  %s1536_s12 = inlined_call_operand.hbm [shape: f32[2,8,8], index: 12, kind: output, shape index: {1}]  }
   0x1   :  { %19 = vsyncpa [#allocation7], 0 }
   0x2   :  { %20 = vsyncpa [#allocation10], 0 }
   0x3   :  { %21 = vsyncpa [#allocation5], 0  ;;  %s40_s23 = sshll.u32 %s1525_s1, 4  ;;  %s41_s23 = int_to_ptr.hbm [resolvable:$true] %s40_s23 }
   0x4   :  { %22 = vsyncpa [#allocation14], 0  ;;  %s1231_s24 = smov [#allocation6]   ;;  %s74_s28 = sshll.u32 %s1531_s7, 4  ;;  %s75_s28 = int_to_ptr.hbm [resolvable:$true] %s74_s28 }
   0x5   :  { %s42_s25 = sshll.u32 %s1231_s24, 4  ;;  %s1232_s29 = smov 64   ;;  %s43_s25 = int_to_ptr.vmem [resolvable:$true] %s42_s25 }
   0x6   :  { %s1233_s30 = smov 4   ;;  %s1234_s13 = smov [#allocation9]  }
   0x7   :  { %48 = dma.hbm_to_vmem [thread:$0]  %s41_s23, 256, %s43_s25, [#allocation7], %s1232_s29, %s1232_s29, %s1233_s30  }
   0x8   :  { %s76_s14 = sshll.u32 %s1234_s13, 4  ;;  %s27_s16 = sshll.u32 %s1524_s0, 4  ;;  %s77_s14 = int_to_ptr.vmem [resolvable:$true] %s76_s14  ;;  %s28_s16 = int_to_ptr.hbm [resolvable:$true] %s27_s16 }
   0x9   :  { %82 = dma.hbm_to_vmem [thread:$0]  %s75_s28, 256, %s77_s14, [#allocation10], %s1232_s29, %s1232_s29, %s1233_s30  }
   0xa   :  { %s1235_s7 = smov [#allocation3]   ;;  %s55_s20 = sshll.u32 %s1527_s3, 4  ;;  %s56_s20 = int_to_ptr.hbm [resolvable:$true] %s55_s20 }
   0xb   :  { %s29_s17 = sshll.u32 %s1235_s7, 4  ;;  %s1236_s21 = smov 128   ;;  %s30_s17 = int_to_ptr.vmem [resolvable:$true] %s29_s17 }
   0xc   :  { %s1237_s22 = smov 8   ;;  %s1238_s0 = smov [#allocation8]  }
   0xd   :  { %35 = dma.hbm_to_vmem [thread:$0]  %s28_s16, 256, %s30_s17, [#allocation4], %s1236_s21, %s1236_s21, %s1237_s22  }
   0xe   :  { %s57_s23 = sshll.u32 %s1238_s0, 4  ;;  %s89_s26 = sshll.u32 %s1533_s9, 4  ;;  %s58_s23 = int_to_ptr.vmem [resolvable:$true] %s57_s23  ;;  %s90_s26 = int_to_ptr.hbm [resolvable:$true] %s89_s26 }
   0xf   :  { %63 = dma.hbm_to_vmem [thread:$0]  %s56_s20, 256, %s58_s23, [#allocation7], %s1232_s29, %s1232_s29, %s1233_s30  }
  0x10   :  { %s1239_s3 = smov [#allocation11]  }
  0x11   :  { %s91_s27 = sshll.u32 %s1239_s3, 4  ;;  %s92_s27 = int_to_ptr.vmem [resolvable:$true] %s91_s27 }
  0x12   :  { %97 = dma.hbm_to_vmem [thread:$0]  %s90_s26, 256, %s92_s27, [#allocation10], %s1232_s29, %s1232_s29, %s1233_s30  }
  0x13   :  { %1221 = dma.done.wait [#allocation4], 256  }
  0x14   :  { %1222 = vsyncadd [#allocation4], 4294967040 }
  0x15   :  { %1223 = dma.done.wait [#allocation7], 512  }
  0x16   :  { %1224 = vsyncadd [#allocation7], 4294966784 }
  0x17   :  { %1225 = dma.done.wait [#allocation10], 512  }
  0x18   :  { %1226 = vsyncadd [#allocation10], 4294966784  ;;  %v977_v0 = vld [vmem:[#allocation6 + $0x8] sm:$0xff]  ;;  %v976_v1 = vld [vmem:[#allocation6] sm:$0xff]  ;;  %vm144_vm0 = vcmask 261120   ;;  %s1240_s30 = smov 120  }
  0x19   :  { %v1350_v2 = vld [vmem:[#allocation3] sm:$0xff]  ;;  %v1352_v3 = vld [vmem:[#allocation3 + $0x8] sm:$0xff]  ;;  %154 = vmatpush.bf16.msra.mxu0 %v977_v0  ;;  %v1009_v5 = vld [vmem:[%s1526_s2] ss:$0 sm:$0xff]  ;;  %s1241_s13 = smov 88   ;;  %s1242_s14 = smov 96  }
  0x1a   :  { %v123_v4 = vpack.c.bf16 %v1352_v3, %v1350_v2  ;;  %s1243_s2 = smov 112   ;;  %s1244_s15 = smov 80   ;;  %vm169_vm1 = vcmask 64512   ;;  %vm270_vm2 = vcmask 1043456   ;;  %vm310_vm11 = vcmask 60416  }
  0x1b   :  { %s1245_s1 = smov 72   ;;  %s1246_s16 = smov 104   ;;  %vm435_vm12 = vcmask 126016   ;;  %vm560_vm13 = vcmask 191616   ;;  %vm685_vm14 = vcmask 257216  }
  0x1c   :  { %s1247_s7 = smov 56   ;;  %s1249_s17 = smov 40  }
  0x1d   :  { %155 = vmatpush.bf16.msra.mxu0 %v976_v1  ;;  %s1250_s18 = smov 16   ;;  %s1251_s19 = smov 24  }
  0x1e   :  { %s900_s28 = sshll.u32 %s1536_s12, 4  ;;  %s901_s28 = int_to_ptr.hbm [resolvable:$true] %s900_s28 }
  0x20   :  { %928 = vmatmul.msk.bf16.vlgmr.msra.gmra.mxu0 %vm144_vm0, %v123_v4 }
  0x9d   :  { %v157_v6 = vpop.f32.mrf.mxu0 }
  0x9e   :  { %v158_v7 = vadd.f32 %v1009_v5, %v157_v6 }
  0xa0   :  { %v162_v8 = vpack.c.bf16 %v158_v7, %v158_v7 }
  0xa2   :  { %v165_v9 = vunpack.c.l.b16 %v162_v8 }
  0xa4   :  { %v1360_v10 = vpack.c.b16 %v165_v9, %v165_v9 }
  0xa5   :  { %v159_v11 = vpop.f32.mrf.mxu0 }
  0xa6   :  { %v160_v12 = vadd.f32 %v1009_v5, %v159_v11  ;;  %313 = vrot.lane.b32.xlu2 %v1360_v10, %s1240_s30  ;;  %315 = vrot.lane.b32.xlu1 %v1360_v10, %s1241_s13 }
  0xa7   :  { %167 = vrot.lane.b32.xlu0 %v1360_v10, %s1242_s14 }
  0xa8   :  { %v163_v13 = vpack.c.bf16 %v160_v12, %v160_v12 }
  0xaa   :  { %v190_v14 = vunpack.c.l.b16 %v163_v13 }
  0xac   :  { %v1365_v15 = vpack.c.b16 %v190_v14, %v190_v14 }
  0xae   :  { %336 = vrot.lane.b32.xlu2 %v1365_v15, %s1240_s30  ;;  %338 = vrot.lane.b32.xlu1 %v1365_v15, %s1241_s13  ;;  %s1254_s13 = smov [#allocation12]  }
  0xaf   :  { %192 = vrot.lane.b32.xlu0 %v1365_v15, %s1242_s14  ;;  %s885_s14 = sshll.u32 %s1254_s13, 4  ;;  %s886_s14 = int_to_ptr.vmem [resolvable:$true] %s885_s14 }
  0xb6   :  { %438 = vrot.lane.b32.xlu2 %v1360_v10, %s1243_s2  ;;  %463 = vrot.lane.b32.xlu1 %v1365_v15, %s1244_s15 }
  0xb7   :  { %440 = vrot.lane.b32.xlu0 %v1360_v10, %s1244_s15  ;;  %s887_s15 = sshll.u32 %s1535_s11, 4  ;;  %s888_s15 = int_to_ptr.hbm [resolvable:$true] %s887_s15 }
  0xbe   :  { %588 = vrot.lane.b32.xlu2 %v1365_v15, %s1245_s1  ;;  %565 = vrot.lane.b32.xlu1 %v1360_v10, %s1245_s1 }
  0xbf   :  { %461 = vrot.lane.b32.xlu0 %v1365_v15, %s1243_s2 }
  0xc6   :  { %586 = vrot.lane.b32.xlu1 %v1365_v15, %s1246_s16 }
  0xc7   :  { %563 = vrot.lane.b32.xlu0 %v1360_v10, %s1246_s16 }
 0x100   :  { %v314_v16 = vpop.permute.xlu2 %313 }
 0x108   :  { %v337_v21 = vpop.permute.xlu2 %336 }
 0x110   :  { %v439_v26 = vpop.permute.xlu2 %438 }
 0x118   :  { %v316_v17 = vpop.permute.xlu1 %315  ;;  %v589_v31 = vpop.permute.xlu2 %588 }
 0x119   :  { %v168_v18 = vpop.permute.xlu0 %167  ;;  %v321_v19 = vsel %vm169_vm1, %v316_v17, 0  ;;  %v594_v34 = vsel %vm169_vm1, %v589_v31, 0 }
 0x11a   :  { %v174_v20 = vsel %vm169_vm1, %v168_v18, 0  ;;  %330 = vmatpush.bf16.xpose.msrb.mxu0 %v321_v19 }
 0x11b   :  { %183 = vmatpush.bf16.xpose.msra.mxu1 %v174_v20 }
 0x120   :  { %v339_v22 = vpop.permute.xlu1 %338 }
 0x121   :  { %v193_v23 = vpop.permute.xlu0 %192  ;;  %933 = vmatmul.msk.bf16.vlgmr.msrb.gmra.mxu0 %vm169_vm1, %v314_v16  ;;  %v344_v24 = vsel %vm169_vm1, %v339_v22, 0 }
 0x122   :  { %929 = vmatmul.msk.bf16.vlgmr.msra.gmra.mxu1 %vm169_vm1, %v162_v8  ;;  %v198_v25 = vsel %vm169_vm1, %v193_v23, 0 }
 0x123   :  { %207 = vmatpush.bf16.xpose.msra.mxu2 %v198_v25  ;;  %353 = vmatpush.bf16.xpose.msrb.mxu1 %v344_v24 }
 0x128   :  { %v464_v27 = vpop.permute.xlu1 %463 }
 0x129   :  { %v469_v28 = vsel %vm169_vm1, %v464_v27, 0  ;;  %v441_v29 = vpop.permute.xlu0 %440 }
 0x12a   :  { %v446_v30 = vsel %vm169_vm1, %v441_v29, 0  ;;  %930 = vmatmul.msk.bf16.vlgmr.msra.gmra.mxu2 %vm169_vm1, %v163_v13 }
 0x12b   :  { %478 = vmatpush.bf16.xpose.msra.mxu1 %v469_v28  ;;  %455 = vmatpush.bf16.xpose.msra.mxu0 %v446_v30 }
 0x130   :  { %v566_v32 = vpop.permute.xlu1 %565 }
 0x131   :  { %v571_v33 = vsel %vm169_vm1, %v566_v32, 0  ;;  %v462_v35 = vpop.permute.xlu0 %461 }
 0x132   :  { %934 = vmatmul.msk.bf16.vlgmr.msrb.gmra.mxu1 %vm169_vm1, %v337_v21  ;;  %937 = vmatmul.msk.bf16.vlgmr.msra.gmra.mxu0 %vm169_vm1, %v439_v26 }
 0x133   :  { %603 = vmatpush.bf16.xpose.msrb.mxu1 %v594_v34  ;;  %580 = vmatpush.bf16.xpose.msrb.mxu0 %v571_v33 }
 0x138   :  { %v587_v37 = vpop.permute.xlu1 %586 }
 0x139   :  { %v564_v36 = vpop.permute.xlu0 %563 }
 0x142   :  { %938 = vmatmul.msk.bf16.vlgmr.msra.gmra.mxu1 %vm169_vm1, %v462_v35  ;;  %941 = vmatmul.msk.bf16.vlgmr.msrb.gmra.mxu0 %vm169_vm1, %v564_v36 }
 0x152   :  { %942 = vmatmul.msk.bf16.vlgmr.msrb.gmra.mxu1 %vm169_vm1, %v587_v37 }
 0x19e   :  { %v332_v38 = vpop.f32.mrf.mxu0 }
 0x19f   :  { %v185_v39 = vpop.f32.mrf.mxu1  ;;  %v359_v40 = vsel %vm169_vm1, %v332_v38, -inf }
 0x1a0   :  { %360 = vmax.xlane.f32.xlu1 %v359_v40  ;;  %v213_v41 = vsel %vm169_vm1, %v185_v39, -inf }
 0x1a1   :  { %214 = vmax.xlane.f32.xlu2 %v213_v41 }
 0x1a6   :  { %v334_v42 = vpop.f32.mrf.mxu0 }
 0x1a7   :  { %v187_v43 = vpop.f32.mrf.mxu1 }
 0x1ad   :  { %v209_v44 = vpop.f32.mrf.mxu2 }
 0x1ae   :  { %v216_v45 = vsel %vm169_vm1, %v209_v44, -inf }
 0x1af   :  { %v355_v46 = vpop.f32.mrf.mxu1  ;;  %217 = vmax.xlane.f32.xlu0 %v216_v45  ;;  %v457_v47 = vpop.f32.mrf.mxu0 }
 0x1b0   :  { %v362_v48 = vsel %vm169_vm1, %v355_v46, -inf  ;;  %v484_v50 = vsel %vm169_vm1, %v457_v47, -inf }
 0x1b1   :  { %363 = vmax.xlane.f32.xlu2 %v362_v48 }
 0x1b5   :  { %v211_v49 = vpop.f32.mrf.mxu2 }
 0x1b7   :  { %v357_v51 = vpop.f32.mrf.mxu1  ;;  %485 = vmax.xlane.f32.xlu0 %v484_v50  ;;  %v459_v52 = vpop.f32.mrf.mxu0 }
 0x1b9   :  { %287 = vrot.lane.b32.xlu1 %v1365_v15, %s1232_s29 }
 0x1bf   :  { %v1401_v53 = vpop.f32.mrf.mxu1  ;;  %v1403_v54 = vpop.f32.mrf.mxu0 }
 0x1c0   :  { %v487_v60 = vsel %vm169_vm1, %v1401_v53, -inf  ;;  %v609_v61 = vsel %vm169_vm1, %v1403_v54, -inf }
 0x1c7   :  { %v482_v55 = vpop.f32.mrf.mxu1  ;;  %v584_v56 = vpop.f32.mrf.mxu0 }
 0x1cb   :  { %265 = vrot.lane.b32.xlu0 %v1360_v10, %s1232_s29  ;;  %s1248_s29 = smov 48  }
 0x1cf   :  { %v1407_v57 = vpop.f32.mrf.mxu1 }
 0x1d0   :  { %v612_v58 = vsel %vm169_vm1, %v1407_v57, -inf }
 0x1d1   :  { %613 = vmax.xlane.f32.xlu2 %v612_v58 }
 0x1d7   :  { %v607_v59 = vpop.f32.mrf.mxu1 }
 0x1e3   :  { %488 = vmax.xlane.f32.xlu1 %v487_v60 }
 0x1eb   :  { %610 = vmax.xlane.f32.xlu1 %v609_v61 }
 0x204   :  { %404 = vrot.lane.b32.xlu1 %v1365_v15, %s1247_s7 }
 0x213   :  { %v361_v62 = vpop.xlane.xlu1 %360 }
 0x214   :  { %v215_v63 = vpop.xlane.xlu2 %214  ;;  %v365_v1 = vsub.f32 %v332_v38, %v361_v62 }
 0x215   :  { %v219_v0 = vsub.f32 %v185_v39, %v215_v63 }
 0x216   :  { %v367_v5 = vmul.f32 1.442695, %v365_v1 }
 0x217   :  { %v221_v4 = vmul.f32 1.442695, %v219_v0 }
 0x219   :  { %1015 = vpow2.f32 %v221_v4 }
 0x21a   :  { %1017 = vpow2.f32 %v367_v5 }
 0x21f   :  { %v1417_v6 = vpop.eup %1015 }
 0x220   :  { %v225_v7 = vsel %vm169_vm1, %v1417_v6, 0.0  ;;  %v1421_v12 = vpop.eup %1017 }
 0x221   :  { %226 = vadd.xlane.f32.xlu2 %v225_v7  ;;  %v371_v17 = vsel %vm169_vm1, %v1421_v12, 0.0 }
 0x222   :  { %v218_v8 = vpop.xlane.xlu0 %217 }
 0x223   :  { %v220_v9 = vsub.f32 %v209_v44, %v218_v8 }
 0x224   :  { %v364_v11 = vpop.xlane.xlu2 %363 }
 0x225   :  { %v223_v13 = vmul.f32 1.442695, %v220_v9  ;;  %v366_v14 = vsub.f32 %v355_v46, %v364_v11 }
 0x227   :  { %1019 = vpow2.f32 %v223_v13  ;;  %v369_v16 = vmul.f32 1.442695, %v366_v14 }
 0x229   :  { %1021 = vpow2.f32 %v369_v16  ;;  %372 = vadd.xlane.f32.xlu2 %v371_v17 }
 0x22a   :  { %v486_v18 = vpop.xlane.xlu0 %485 }
 0x22b   :  { %v490_v19 = vsub.f32 %v457_v47, %v486_v18  ;;  %v288_v27 = vpop.permute.xlu1 %287 }
 0x22c   :  { %v293_v30 = vsel %vm270_vm2, %v288_v27, 0 }
 0x22d   :  { %v1425_v20 = vpop.eup %1019  ;;  %v492_v21 = vmul.f32 1.442695, %v490_v19 }
 0x22e   :  { %v228_v24 = vsel %vm169_vm1, %v1425_v20, 0.0 }
 0x22f   :  { %v1427_v22 = vpop.eup %1021  ;;  %1023 = vpow2.f32 %v492_v21 }
 0x230   :  { %v374_v23 = vsel %vm169_vm1, %v1427_v22, 0.0 }
 0x231   :  { %375 = vadd.xlane.f32.xlu0 %v374_v23  ;;  %229 = vadd.xlane.f32.xlu2 %v228_v24 }
 0x235   :  { %v1433_v25 = vpop.eup %1023 }
 0x236   :  { %v496_v26 = vsel %vm169_vm1, %v1433_v25, 0.0 }
 0x237   :  { %497 = vadd.xlane.f32.xlu1 %v496_v26 }
 0x23d   :  { %v266_v28 = vpop.permute.xlu0 %265 }
 0x23e   :  { %v272_v29 = vsel %vm270_vm2, %v266_v28, 0 }
 0x23f   :  { %281 = vmatpush.bf16.msra.mxu3 %v272_v29 }
 0x243   :  { %302 = vmatpush.bf16.msrb.mxu3 %v293_v30 }
 0x244   :  { %v614_v37 = vpop.xlane.xlu2 %613 }
 0x245   :  { %508 = vrot.lane.b32.xlu0 %v1360_v10, %s1248_s29  ;;  %v616_v38 = vsub.f32 %v1407_v57, %v614_v37 }
 0x249   :  { %383 = vrot.lane.b32.xlu2 %v1360_v10, %s1247_s7 }
 0x24d   :  { %529 = vrot.lane.b32.xlu0 %v1365_v15, %s1248_s29 }
 0x255   :  { %633 = vrot.lane.b32.xlu0 %v1360_v10, %s1249_s17  ;;  %v619_v10 = vmul.f32 1.442695, %v616_v38 }
 0x256   :  { %v489_v31 = vpop.xlane.xlu1 %488 }
 0x257   :  { %v491_v34 = vsub.f32 %v1401_v53, %v489_v31 }
 0x259   :  { %v494_v36 = vmul.f32 1.442695, %v491_v34 }
 0x25e   :  { %v611_v32 = vpop.xlane.xlu1 %610 }
 0x25f   :  { %v615_v33 = vsub.f32 %v1403_v54, %v611_v32 }
 0x261   :  { %v617_v35 = vmul.f32 1.442695, %v615_v33 }
 0x263   :  { %1025 = vpow2.f32 %v617_v35 }
 0x264   :  { %1027 = vpow2.f32 %v494_v36 }
 0x265   :  { %1029 = vpow2.f32 %v619_v10 }
 0x269   :  { %v1447_v39 = vpop.eup %1025 }
 0x26a   :  { %v621_v40 = vsel %vm169_vm1, %v1447_v39, 0.0  ;;  %v1451_v41 = vpop.eup %1027 }
 0x26b   :  { %622 = vadd.xlane.f32.xlu1 %v621_v40  ;;  %v499_v42 = vsel %vm169_vm1, %v1451_v41, 0.0  ;;  %v1455_v43 = vpop.eup %1029 }
 0x26c   :  { %v624_v44 = vsel %vm169_vm1, %v1455_v43, 0.0 }
 0x272   :  { %500 = vadd.xlane.f32.xlu2 %v499_v42 }
 0x276   :  { %v405_v57 = vpop.permute.xlu1 %404 }
 0x277   :  { %v410_v62 = vsel %vm270_vm2, %v405_v57, 0 }
 0x27a   :  { %625 = vadd.xlane.f32.xlu2 %v624_v44 }
 0x284   :  { %654 = vrot.lane.b32.xlu1 %v1365_v15, %s1249_s17 }
 0x294   :  { %v227_v45 = vpop.xlane.xlu2 %226 }
 0x295   :  { %1031 = vrcp.f32 %v227_v45  ;;  %v242_v51 = vand.u32 2147483648, %v227_v45  ;;  %v240_v52 = vand.u32 2147483647, %v227_v45  ;;  %vm236_vm4 = vweird.f32 %v227_v45 }
 0x297   :  { %v243_v54 = vor.u32 1.1754944e-38, %v242_v51  ;;  %vm241_vm6 = vcmp.eq.f32.partialorder %v240_v52, 8.507059e+37 }
 0x29b   :  { %v1032_v46 = vpop.eup %1031 }
 0x29c   :  { %v232_v47 = vmul.f32 %v1032_v46, %v227_v45  ;;  %v373_v48 = vpop.xlane.xlu2 %372  ;;  %vm237_vm3 = vweird.f32 %v1032_v46 }
 0x29d   :  { %1033 = vrcp.f32 %v373_v48  ;;  %vm238_vm5 = vmor %vm236_vm4, %vm237_vm3 }
 0x29e   :  { %v233_v49 = vsub.f32 1.0, %v232_v47 }
 0x2a0   :  { %v234_v50 = vmul.f32 %v1032_v46, %v233_v49 }
 0x2a2   :  { %v235_v53 = vadd.f32 %v1032_v46, %v234_v50 }
 0x2a3   :  { %v1034_v59 = vpop.eup %1033 }
 0x2a4   :  { %v230_v55 = vpop.xlane.xlu2 %229  ;;  %v239_v56 = vsel %vm238_vm5, %v1032_v46, %v235_v53  ;;  %v379_v63 = vmul.f32 %v1034_v59, %v1421_v12 }
 0x2a5   :  { %1035 = vrcp.f32 %v230_v55  ;;  %v244_v15 = vsel %vm241_vm6, %v243_v54, %v239_v56  ;;  %v257_v7 = vand.u32 2147483648, %v230_v55  ;;  %v255_v13 = vand.u32 2147483647, %v230_v55 }
 0x2a6   :  { %v245_v58 = vmul.f32 %v1417_v6, %v244_v15  ;;  %v376_v6 = vpop.xlane.xlu0 %375  ;;  %v381_v9 = vpack.c.bf16 %v379_v63, %v379_v63  ;;  %vm251_vm8 = vweird.f32 %v230_v55 }
 0x2a7   :  { %v258_v12 = vor.u32 1.1754944e-38, %v257_v7  ;;  %vm256_vm10 = vcmp.eq.f32.partialorder %v255_v13, 8.507059e+37 }
 0x2a8   :  { %v263_v60 = vpack.c.bf16 %v245_v58, %v245_v58  ;;  %261 = vst.msk [vmem:[#allocation13] sm:$0xff] %vm169_vm1, %v245_v58 }
 0x2aa   :  { %931 = vmatmul.msk.bf16.vlgmr.msra.gmra.mxu3 %vm169_vm1, %v263_v60  ;;  %v498_v8 = vpop.xlane.xlu1 %497 }
 0x2ab   :  { %v1036_v61 = vpop.eup %1035  ;;  %419 = vmatpush.bf16.msra.mxu3 %v410_v62  ;;  %1037 = vrcp.f32 %v498_v8 }
 0x2ac   :  { %v247_v0 = vmul.f32 %v1036_v61, %v230_v55  ;;  %v384_v1 = vpop.permute.xlu2 %383  ;;  %vm252_vm7 = vweird.f32 %v1036_v61  ;;  %1039 = vrcp.f32 %v376_v6 }
 0x2ad   :  { %v389_v4 = vsel %vm270_vm2, %v384_v1, 0  ;;  %vm253_vm9 = vmor %vm251_vm8, %vm252_vm7 }
 0x2ae   :  { %v248_v5 = vsub.f32 1.0, %v247_v0  ;;  %398 = vmatpush.bf16.msrb.mxu2 %v389_v4 }
 0x2b0   :  { %v249_v11 = vmul.f32 %v1036_v61, %v248_v5 }
 0x2b1   :  { %935 = vmatmul.msk.bf16.vlgmr.msrb.gmra.mxu2 %vm169_vm1, %v381_v9  ;;  %v1038_v21 = vpop.eup %1037  ;;  %v980_v9 = vld [vmem:[#allocation8 + $0x8] sm:$0xff] }
 0x2b2   :  { %v250_v14 = vadd.f32 %v1036_v61, %v249_v11  ;;  %v504_v26 = vmul.f32 %v1038_v21, %v1433_v25  ;;  %724 = vmatpush.bf16.msra.mxu0 %v980_v9  ;;  %v979_v11 = vld [vmem:[#allocation8] sm:$0xff] }
 0x2b3   :  { %v983_v9 = vld [vmem:[#allocation11] sm:$0xff] }
 0x2b4   :  { %v254_v16 = vsel %vm253_vm9, %v1036_v61, %v250_v14  ;;  %v506_v27 = vpack.c.bf16 %v504_v26, %v504_v26 }
 0x2b5   :  { %v259_v17 = vsel %vm256_vm10, %v258_v12, %v254_v16 }
 0x2b6   :  { %v260_v18 = vmul.f32 %v1425_v20, %v259_v17  ;;  %v1040_v20 = vpop.eup %1039  ;;  %725 = vmatpush.bf16.msra.mxu0 %v979_v11  ;;  %v1010_v17 = vld [vmem:[%s1528_s4] ss:$0 sm:$0xff] }
 0x2b7   :  { %v509_v19 = vpop.permute.xlu0 %508  ;;  %v380_v30 = vmul.f32 %v1040_v20, %v1427_v22 }
 0x2b8   :  { %v514_v23 = vsel %vm270_vm2, %v509_v19, 0  ;;  %v264_v24 = vpack.c.bf16 %v260_v18, %v260_v18  ;;  %262 = vst.msk [vmem:[#allocation13 + $0x8] sm:$0xff] %vm169_vm1, %v260_v18 }
 0x2b9   :  { %523 = vmatpush.bf16.msra.mxu2 %v514_v23  ;;  %v382_v33 = vpack.c.bf16 %v380_v30, %v380_v30 }
 0x2ba   :  { %932 = vmatmul.msk.bf16.vlgmr.msrb.gmra.mxu3 %vm169_vm1, %v264_v24 }
 0x2bf   :  { %v530_v28 = vpop.permute.xlu0 %529 }
 0x2c0   :  { %v535_v29 = vsel %vm270_vm2, %v530_v28, 0 }
 0x2c1   :  { %939 = vmatmul.msk.bf16.vlgmr.msra.gmra.mxu2 %vm169_vm1, %v506_v27  ;;  %544 = vmatpush.bf16.msrb.mxu3 %v535_v29  ;;  %v1252_v29 = vmov 32.0  }
 0x2c7   :  { %v634_v31 = vpop.permute.xlu0 %633 }
 0x2c8   :  { %v639_v32 = vsel %vm270_vm2, %v634_v31, 0 }
 0x2c9   :  { %648 = vmatpush.bf16.msrb.mxu2 %v639_v32 }
 0x2ca   :  { %936 = vmatmul.msk.bf16.vlgmr.msra.gmra.mxu3 %vm169_vm1, %v382_v33 }
 0x2de   :  { %v623_v25 = vpop.xlane.xlu1 %622 }
 0x2df   :  { %1041 = vrcp.f32 %v623_v25 }
 0x2e5   :  { %v1042_v34 = vpop.eup %1041  ;;  %v501_v35 = vpop.xlane.xlu2 %500 }
 0x2e6   :  { %v629_v36 = vmul.f32 %v1042_v34, %v1447_v39  ;;  %1043 = vrcp.f32 %v501_v35 }
 0x2e8   :  { %v631_v37 = vpack.c.bf16 %v629_v36, %v629_v36 }
 0x2ea   :  { %943 = vmatmul.msk.bf16.vlgmr.msrb.gmra.mxu2 %vm169_vm1, %v631_v37 }
 0x2ec   :  { %v1044_v38 = vpop.eup %1043 }
 0x2ed   :  { %v505_v22 = vmul.f32 %v1044_v38, %v1451_v41  ;;  %v626_v10 = vpop.xlane.xlu2 %625 }
 0x2ee   :  { %1045 = vrcp.f32 %v626_v10 }
 0x2ef   :  { %v507_v40 = vpack.c.bf16 %v505_v22, %v505_v22  ;;  %1047 = vrcp.f32 %v1252_v29 }
 0x2f1   :  { %940 = vmatmul.msk.bf16.vlgmr.msrb.gmra.mxu3 %vm169_vm1, %v507_v40 }
 0x2f4   :  { %v1046_v45 = vpop.eup %1045 }
 0x2f5   :  { %v630_v46 = vmul.f32 %v1046_v45, %v1455_v43  ;;  %v1048_v20 = vpop.eup %1047 }
 0x2f6   :  { %v655_v42 = vpop.permute.xlu1 %654  ;;  %v741_v30 = vmul.f32 32.0, %v1048_v20  ;;  %vm745_vm15 = vweird.f32 %v1048_v20 }
 0x2f7   :  { %v660_v44 = vsel %vm270_vm2, %v655_v42, 0  ;;  %v632_v39 = vpack.c.bf16 %v630_v46, %v630_v46 }
 0x2f8   :  { %669 = vmatpush.bf16.msra.mxu3 %v660_v44  ;;  %v742_v31 = vsub.f32 1.0, %v741_v30  ;;  %v982_v44 = vld [vmem:[#allocation9 + $0x8] sm:$0xff] }
 0x2f9   :  { %827 = vmatpush.bf16.msra.mxu1 %v982_v44 }
 0x2fa   :  { %v743_v32 = vmul.f32 %v1048_v20, %v742_v31 }
 0x2fc   :  { %v744_v33 = vadd.f32 %v1048_v20, %v743_v32 }
 0x2fe   :  { %v746_v25 = vsel %vm745_vm15, %v1048_v20, %v744_v33 }
 0x301   :  { %944 = vmatmul.msk.bf16.vlgmr.msra.gmra.mxu3 %vm169_vm1, %v632_v39  ;;  %v981_v39 = vld [vmem:[#allocation9] sm:$0xff] }
 0x302   :  { %828 = vmatpush.bf16.msra.mxu1 %v981_v39 }
 0x32d   :  { %v283_v47 = vpop.f32.mrf.mxu3 }
 0x32e   :  { %v308_v48 = vpack.c.bf16 %v283_v47, %v283_v47 }
 0x330   :  { %311 = vst.msk [vmem:[#allocation2] sm:$0xf] %vm310_vm11, %v308_v48 }
 0x334   :  { %v400_v41 = vpop.f32.mrf.mxu2 }
 0x335   :  { %v425_v49 = vpack.c.bf16 %v400_v41, %v400_v41  ;;  %v285_v50 = vpop.f32.mrf.mxu3 }
 0x337   :  { %429 = vrot.lane.b32.xlu2 %v425_v49, %s1237_s22 }
 0x33c   :  { %v402_v51 = vpop.f32.mrf.mxu2 }
 0x33d   :  { %v304_v52 = vpop.f32.mrf.mxu3 }
 0x33e   :  { %v309_v53 = vpack.c.bf16 %v304_v52, %v304_v52 }
 0x340   :  { %312 = vst.msk [vmem:[#allocation2 + $0x4] sm:$0xf] %vm310_vm11, %v309_v53 }
 0x344   :  { %v525_v54 = vpop.f32.mrf.mxu2 }
 0x345   :  { %v550_v55 = vpack.c.bf16 %v525_v54, %v525_v54  ;;  %v306_v56 = vpop.f32.mrf.mxu3 }
 0x347   :  { %554 = vrot.lane.b32.xlu0 %v550_v55, %s1250_s18 }
 0x34c   :  { %v527_v43 = vpop.f32.mrf.mxu2 }
 0x34d   :  { %v421_v15 = vpop.f32.mrf.mxu3 }
 0x34e   :  { %v426_v57 = vpack.c.bf16 %v421_v15, %v421_v15 }
 0x350   :  { %431 = vrot.lane.b32.xlu0 %v426_v57, %s1237_s22 }
 0x355   :  { %v423_v58 = vpop.f32.mrf.mxu3 }
 0x36d   :  { %v650_v59 = vpop.f32.mrf.mxu2 }
 0x36e   :  { %v675_v60 = vpack.c.bf16 %v650_v59, %v650_v59  ;;  %v1011_v59 = vld [vmem:[%s1529_s5] ss:$0 sm:$0xff] }
 0x370   :  { %679 = vrot.lane.b32.xlu1 %v675_v60, %s1251_s19 }
 0x374   :  { %v546_v61 = vpop.f32.mrf.mxu3 }
 0x375   :  { %v551_v62 = vpack.c.bf16 %v546_v61, %v546_v61  ;;  %v652_v63 = vpop.f32.mrf.mxu2 }
 0x376   :  { %v1012_v63 = vld [vmem:[%s1530_s6] ss:$0 sm:$0xff]  ;;  %s1253_s6 = smov [#allocation13]  }
 0x377   :  { %556 = vrot.lane.b32.xlu0 %v551_v62, %s1250_s18  ;;  %s898_s3 = sshll.u32 %s1253_s6, 4  ;;  %s899_s3 = int_to_ptr.vmem [resolvable:$true] %s898_s3 }
 0x378   :  { %906 = dma.vmem_to_hbm [thread:$0]  %s899_s3, 256, %s901_s28, [#allocation14], %s1236_s21, %s1236_s21, %s1237_s22  }
 0x37c   :  { %v548_v0 = vpop.f32.mrf.mxu3 }
 0x384   :  { %v671_v1 = vpop.f32.mrf.mxu3 }
 0x385   :  { %v676_v4 = vpack.c.bf16 %v671_v1, %v671_v1 }
 0x387   :  { %681 = vrot.lane.b32.xlu2 %v676_v4, %s1251_s19 }
 0x38c   :  { %v673_v5 = vpop.f32.mrf.mxu3 }
 0x391   :  { %v430_v7 = vpop.permute.xlu2 %429 }
 0x392   :  { %436 = vst.msk [vmem:[#allocation2] sm:$0xf] %vm435_vm12, %v430_v7 }
 0x3b9   :  { %v555_v6 = vpop.permute.xlu0 %554 }
 0x3ba   :  { %561 = vst.msk [vmem:[#allocation2] sm:$0xf] %vm560_vm13, %v555_v6 }
 0x3c2   :  { %v432_v8 = vpop.permute.xlu0 %431 }
 0x3c3   :  { %437 = vst.msk [vmem:[#allocation2 + $0x4] sm:$0xf] %vm435_vm12, %v432_v8  ;;  %v984_v8 = vld [vmem:[#allocation11 + $0x8] sm:$0xff] }
 0x3c4   :  { %863 = vmatpush.bf16.msra.mxu2 %v984_v8 }
 0x3c8   :  { %864 = vmatpush.bf16.msra.mxu2 %v983_v9 }
 0x3e1   :  { %v682_v12 = vpop.permute.xlu2 %681 }
 0x3e2   :  { %v680_v13 = vpop.permute.xlu1 %679 }
 0x3e3   :  { %686 = vst.msk [vmem:[#allocation2] sm:$0xf] %vm685_vm14, %v680_v13  ;;  %v1013_v13 = vld [vmem:[%s1532_s8] ss:$0 sm:$0xff] }
 0x3e9   :  { %v557_v14 = vpop.permute.xlu0 %556 }
 0x3ea   :  { %562 = vst.msk [vmem:[#allocation2 + $0x4] sm:$0xf] %vm560_vm13, %v557_v14 }
 0x3eb   :  { %687 = vst.msk [vmem:[#allocation2 + $0x4] sm:$0xf] %vm685_vm14, %v682_v12 }
 0x3f2   :  { %v978_v16 = vld [vmem:[#allocation2] sm:$0xff] }
 0x3f3   :  { %957 = vmatmul.msk.bf16.vlgmr.msra.gmra.mxu0 %vm144_vm0, %v978_v16 }
 0x470   :  { %v727_v18 = vpop.f32.mrf.mxu0 }
 0x471   :  { %v728_v19 = vadd.f32 %v1010_v17, %v727_v18 }
 0x473   :  { %v732_v21 = vadd.f32 %v728_v19, %v1350_v2 }
 0x475   :  { %v734_v23 = vsel %vm144_vm0, %v732_v21, 0.0 }
 0x476   :  { %735 = vadd.xlane.f32.xlu0 %v734_v23 }
 0x478   :  { %v729_v24 = vpop.f32.mrf.mxu0 }
 0x479   :  { %v730_v26 = vadd.f32 %v1010_v17, %v729_v24 }
 0x47b   :  { %v733_v27 = vadd.f32 %v730_v26, %v1352_v3 }
 0x47d   :  { %v737_v28 = vsel %vm144_vm0, %v733_v27, 0.0 }
 0x47e   :  { %738 = vadd.xlane.f32.xlu1 %v737_v28 }
 0x4e9   :  { %v736_v2 = vpop.xlane.xlu0 %735 }
 0x4ea   :  { %v747_v34 = vmul.f32 %v746_v25, %v736_v2 }
 0x4ec   :  { %v749_v35 = vsub.f32 %v732_v21, %v747_v34  ;;  %v1014_v21 = vld [vmem:[%s1534_s10] ss:$0 sm:$0xff] }
 0x4ee   :  { %v751_v36 = vmul.f32 %v749_v35, %v749_v35 }
 0x4f0   :  { %v753_v37 = vsel %vm144_vm0, %v751_v36, 0.0 }
 0x4f1   :  { %v739_v38 = vpop.xlane.xlu1 %738  ;;  %754 = vadd.xlane.f32.xlu2 %v753_v37 }
 0x4f2   :  { %v748_v3 = vmul.f32 %v746_v25, %v739_v38 }
 0x4f4   :  { %v750_v22 = vsub.f32 %v733_v27, %v748_v3 }
 0x4f6   :  { %v752_v40 = vmul.f32 %v750_v22, %v750_v22 }
 0x4f8   :  { %v756_v10 = vsel %vm144_vm0, %v752_v40, 0.0 }
 0x4f9   :  { %757 = vadd.xlane.f32.xlu0 %v756_v10 }
 0x564   :  { %v755_v42 = vpop.xlane.xlu2 %754 }
 0x565   :  { %v759_v45 = vmul.f32 %v755_v42, %v746_v25 }
 0x567   :  { %v761_v46 = vadd.f32 1e-05, %v759_v45 }
 0x569   :  { %1049 = vrsqrt.f32 %v761_v46  ;;  %vm769_vm2 = vweird.f32 %v761_v46 }
 0x56c   :  { %v758_v47 = vpop.xlane.xlu0 %757 }
 0x56d   :  { %v760_v48 = vmul.f32 %v758_v47, %v746_v25 }
 0x56f   :  { %v1050_v41 = vpop.eup %1049  ;;  %v762_v49 = vadd.f32 1e-05, %v760_v48 }
 0x570   :  { %v764_v50 = vmul.f32 %v1050_v41, %v761_v46  ;;  %vm770_vm1 = vweird.f32 %v1050_v41 }
 0x571   :  { %1051 = vrsqrt.f32 %v762_v49  ;;  %vm771_vm3 = vmor %vm769_vm2, %vm770_vm1  ;;  %vm779_vm5 = vweird.f32 %v762_v49 }
 0x572   :  { %v765_v51 = vmul.f32 %v1050_v41, %v764_v50 }
 0x574   :  { %v766_v52 = vmul.f32 0.5, %v765_v51 }
 0x576   :  { %v767_v53 = vsub.f32 1.5, %v766_v52 }
 0x577   :  { %v1052_v54 = vpop.eup %1051 }
 0x578   :  { %v768_v55 = vmul.f32 %v1050_v41, %v767_v53  ;;  %v774_v56 = vmul.f32 %v1052_v54, %v762_v49  ;;  %vm780_vm4 = vweird.f32 %v1052_v54 }
 0x579   :  { %vm781_vm6 = vmor %vm779_vm5, %vm780_vm4 }
 0x57a   :  { %v775_v43 = vmul.f32 %v1052_v54, %v774_v56  ;;  %v772_v15 = vsel %vm771_vm3, %v1050_v41, %v768_v55 }
 0x57b   :  { %v783_v60 = vmul.f32 %v772_v15, %v749_v35 }
 0x57c   :  { %v776_v57 = vmul.f32 0.5, %v775_v43 }
 0x57d   :  { %v789_v0 = vmul.f32 %v1011_v59, %v783_v60 }
 0x57e   :  { %v777_v58 = vsub.f32 1.5, %v776_v57 }
 0x57f   :  { %v795_v5 = vadd.f32 %v1012_v63, %v789_v0 }
 0x580   :  { %v778_v61 = vmul.f32 %v1052_v54, %v777_v58 }
 0x582   :  { %v782_v62 = vsel %vm781_vm6, %v1052_v54, %v778_v61 }
 0x583   :  { %v784_v1 = vmul.f32 %v782_v62, %v750_v22 }
 0x585   :  { %v790_v4 = vmul.f32 %v1011_v59, %v784_v1 }
 0x587   :  { %v796_v7 = vadd.f32 %v1012_v63, %v790_v4 }
 0x589   :  { %v797_v6 = vpack.c.bf16 %v796_v7, %v795_v5 }
 0x58b   :  { %966 = vmatmul.msk.bf16.vlgmr.msra.gmra.mxu1 %vm144_vm0, %v797_v6 }
 0x608   :  { %v830_v11 = vpop.f32.mrf.mxu1 }
 0x609   :  { %v831_v14 = vadd.f32 %v1013_v13, %v830_v11 }
 0x60b   :  { %v835_v17 = vmax.f32 %v831_v14, 0.0 }
 0x610   :  { %v832_v12 = vpop.f32.mrf.mxu1 }
 0x611   :  { %v833_v16 = vadd.f32 %v1013_v13, %v832_v12 }
 0x613   :  { %v836_v18 = vmax.f32 %v833_v16, 0.0 }
 0x615   :  { %v837_v19 = vpack.c.bf16 %v836_v18, %v835_v17 }
 0x617   :  { %975 = vmatmul.msk.bf16.vlgmr.msra.gmra.mxu2 %vm144_vm0, %v837_v19 }
 0x69a   :  { %v866_v23 = vpop.f32.mrf.mxu2 }
 0x69b   :  { %v871_v24 = vadd.f32 %v866_v23, %v795_v5 }
 0x69d   :  { %v877_v26 = vadd.f32 %v1014_v21, %v871_v24 }
 0x69f   :  { %879 = vst.msk [vmem:[#allocation12] sm:$0xff] %vm144_vm0, %v877_v26 }
 0x6a2   :  { %v868_v27 = vpop.f32.mrf.mxu2 }
 0x6a3   :  { %v872_v28 = vadd.f32 %v868_v27, %v796_v7 }
 0x6a5   :  { %v878_v29 = vadd.f32 %v1014_v21, %v872_v28 }
 0x6a7   :  { %880 = vst.msk [vmem:[#allocation12 + $0x8] sm:$0xff] %vm144_vm0, %v878_v29 }
 0x6a8   :  { %893 = dma.vmem_to_hbm [thread:$0]  %s886_s14, 256, %s888_s15, [#allocation5], %s1236_s21, %s1236_s21, %s1237_s22  }
 0x6a9   :  { %1227 = dma.done.wait [#allocation5], 256  }
 0x6aa   :  { %1228 = vsyncadd [#allocation5], 4294967040 }
 0x6ab   :  { %1229 = dma.done.wait [#allocation14], 256  }
 0x6ac   :  { %1230 = vsyncadd [#allocation14], 4294967040 }
 0x6ad   :  { %915 = vsyncpa [#allocation4], 1 }
 0x6ae   :  { %916 = vsyncpa [#allocation7], 1 }
 0x6af   :  { %917 = vsyncpa [#allocation10], 1 }
 0x6b0   :  { %918 = vsyncpa [#allocation5], 1 }
 0x6b1   :  { %919 = vsyncpa [#allocation14], 1 }

</bundles_post_ra>
